<compile_context>
chip_gen: v7x
topology: tpu7x:2x2x1
jax: 0.10.0
libtpu: 0.0.40
codegen_flags: <defaults>
</compile_context>

<pallas_src>
import jax
import jax.numpy as jnp
from jax.experimental import pallas as pl
from jax.experimental.pallas import tpu as pltpu

# Logical layer dims of the PyTorch forward chain:
# 784 -> 516 -> 256 -> 128 -> 64 -> 32 -> 10
LAYER_DIMS = [784, 516, 256, 128, 64, 32, 10]

H1_PAD = 640       # 516 padded up to a multiple of 128 (lane width)
OUT_PAD = 128      # 10 padded up to one full vreg lane width
TB_MAX = 256       # max batch tile: multiple of 8 and of MXU M dimension
NEG_BIG = -1e30    # "minus infinity" bias for padded softmax lanes


def ffnn_kernel(x_ref,
                w1_ref, b1_ref, w2_ref, b2_ref, w3_ref, b3_ref,
                w4_ref, b4_ref, w5_ref, b5_ref, wn_ref, bn_ref,
                o_ref):
    """One batch tile through the whole MLP.

    4x (matmul + bias + ReLU), matmul + bias + sigmoid,
    matmul + bias + softmax(dim=1). bf16 operands, f32 MXU accumulation.
    """
    h = x_ref[...]  # (tb, 784) bf16

    # l1..l4: ReLU layers (MXU matmul + VPU elementwise)
    for w_ref, b_ref in ((w1_ref, b1_ref), (w2_ref, b2_ref),
                         (w3_ref, b3_ref), (w4_ref, b4_ref)):
        z = jnp.dot(h, w_ref[...], preferred_element_type=jnp.float32) + b_ref[...]
        h = jnp.maximum(z, 0.0).astype(jnp.bfloat16)

    # l5: sigmoid (overflow-free form; exp and reciprocal both on the EUP slot)
    z5 = jnp.dot(h, w5_ref[...], preferred_element_type=jnp.float32) + b5_ref[...]
    ez = jnp.exp(-jnp.abs(z5))
    inv = pl.reciprocal(1.0 + ez, approx=True)
    h = jnp.where(z5 >= 0.0, inv, ez * inv).astype(jnp.bfloat16)

    # ln: final linear + numerically-stable softmax over the (lane-padded)
    # feature axis. Padded lanes carry a -1e30 bias -> exp() == 0 exactly.
    z = jnp.dot(h, wn_ref[...], preferred_element_type=jnp.float32) + bn_ref[...]
    z = z - jnp.max(z, axis=1, keepdims=True)
    e = jnp.exp(z)
    inv_denom = pl.reciprocal(jnp.sum(e, axis=1, keepdims=True), approx=True)
    o_ref[...] = (e * inv_denom).astype(o_ref.dtype)


def init_params(key):
    """Deterministic PyTorch-style Linear init: U(-1/sqrt(fan_in), 1/sqrt(fan_in)).

    Weights are stored as (in_features, out_features) — transpose of PyTorch's
    (out, in) — so the kernel does plain `x @ W + b`.
    """
    params = []
    dims = LAYER_DIMS
    for i in range(len(dims) - 1):
        fan_in, fan_out = dims[i], dims[i + 1]
        key, kw, kb = jax.random.split(key, 3)
        bound = 1.0 / jnp.sqrt(jnp.float32(fan_in))
        w = jax.random.uniform(kw, (fan_in, fan_out), jnp.float32, -bound, bound)
        b = jax.random.uniform(kb, (1, fan_out), jnp.float32, -bound, bound)
        params += [w, b]
    return params


def prepare_params(params):
    """One-time wrapper-side prep: lane padding + bf16 weight cast.

    * l1's 516 outputs / l2's 516 inputs zero-padded to 640: padded units have
      zero weight & bias, ReLU(0)=0, and their zero rows in W2 contribute
      nothing downstream — forward output unchanged.
    * ln's 10 outputs padded to 128 with zero weights and a -1e30 bias so the
      padded softmax lanes are exactly 0.
    """
    w1, b1, w2, b2, w3, b3, w4, b4, w5, b5, wn, bn = params

    w1p = jnp.pad(w1, ((0, 0), (0, H1_PAD - w1.shape[1])))
    b1p = jnp.pad(b1, ((0, 0), (0, H1_PAD - b1.shape[1])))
    w2p = jnp.pad(w2, ((0, H1_PAD - w2.shape[0]), (0, 0)))

    wnp = jnp.pad(wn, ((0, 0), (0, OUT_PAD - wn.shape[1])))
    bnp = jnp.pad(bn, ((0, 0), (0, OUT_PAD - bn.shape[1])),
                  constant_values=NEG_BIG)

    bf16 = jnp.bfloat16
    return (w1p.astype(bf16), b1p.astype(jnp.float32),
            w2p.astype(bf16), b2.astype(jnp.float32),
            w3.astype(bf16), b3.astype(jnp.float32),
            w4.astype(bf16), b4.astype(jnp.float32),
            w5.astype(bf16), b5.astype(jnp.float32),
            wnp.astype(bf16), bnp.astype(jnp.float32))


@jax.jit
def feed_forward_nn(x_nchw, *prepared_params):
    # glue: x.view(-1, 784)
    x = x_nchw.reshape(-1, 784)
    batch = x.shape[0]

    # Adaptive batch tile: at least sublane-aligned (8), at most TB_MAX.
    tb = min(TB_MAX, pl.cdiv(batch, 8) * 8)

    # Pad batch to a multiple of the tile so the grid is rectangular; padded
    # rows are computed but sliced off below.
    b_pad = pl.cdiv(batch, tb) * tb
    x = jnp.pad(x, ((0, b_pad - batch), (0, 0))).astype(jnp.bfloat16)

    grid = (b_pad // tb,)

    # x / output: tiled over batch. Weights & biases: one resident block each
    # (constant index_map -> DMA'd once, held in VMEM across all grid steps).
    x_spec = pl.BlockSpec((tb, 784), lambda i: (i, 0))
    out_spec = pl.BlockSpec((tb, OUT_PAD), lambda i: (i, 0))
    const_specs = [pl.BlockSpec(p.shape, lambda i: (0, 0))
                   for p in prepared_params]

    out_padded = pl.pallas_call(
        ffnn_kernel,
        out_shape=jax.ShapeDtypeStruct((b_pad, OUT_PAD), jnp.float32),
        grid=grid,
        in_specs=[x_spec] + const_specs,
        out_specs=out_spec,
        compiler_params=pltpu.CompilerParams(
            dimension_semantics=("parallel",),
            vmem_limit_bytes=32 << 20),
    )(x, *prepared_params)

    # Strip batch padding and the 118 dead output lanes.
    return out_padded[:batch, :LAYER_DIMS[-1]]


def reference_forward(x_nchw, params):
    """Pure-JAX f32 reference of the same forward chain (for sanity checking)."""
    x = x_nchw.reshape(-1, 784).astype(jnp.float32)
    w1, b1, w2, b2, w3, b3, w4, b4, w5, b5, wn, bn = params
    h = x
    for w, b in ((w1, b1), (w2, b2), (w3, b3), (w4, b4)):
        h = jnp.maximum(h @ w + b, 0.0)
    h = jax.nn.sigmoid(h @ w5 + b5)
    return jax.nn.softmax(h @ wn + bn, axis=1)


if __name__ == "__main__":
    key = jax.random.PRNGKey(0)
    key, kx = jax.random.split(key)

    # Small MNIST-like batch, NCHW layout: (batch=2, channels=1, 28, 28)
    x = jax.random.normal(kx, (2, 1, 28, 28), jnp.float32)

    params = init_params(jax.random.PRNGKey(0))
    prepared = prepare_params(params)

    out = feed_forward_nn(x, *prepared)
    out = jax.block_until_ready(out)

    # sanity: softmax output shape (2, 10), finite, rows sum to ~1
    assert out.shape == (2, 10)
    assert bool(jnp.all(jnp.isfinite(out)))
    assert jnp.allclose(jnp.sum(out, axis=1), 1.0, atol=2e-3)

    # loose agreement with a pure-JAX f32 reference (bf16 matmuls + approx
    # reciprocal introduce small error)
    ref = reference_forward(x, params)
    assert jnp.allclose(out, ref, atol=5e-2)

    print("KERNEL_OK")
</pallas_src>

<mosaic_0001>
module attributes {stable_mosaic.version = 11 : i64} {
  func.func @ffnn_kernel(%arg0: i32, %arg1: memref<8x784xbf16, #tpu.memory_space<vmem>>, %arg2: memref<784x640xbf16, #tpu.memory_space<vmem>>, %arg3: memref<1x640xf32, #tpu.memory_space<vmem>>, %arg4: memref<640x256xbf16, #tpu.memory_space<vmem>>, %arg5: memref<1x256xf32, #tpu.memory_space<vmem>>, %arg6: memref<256x128xbf16, #tpu.memory_space<vmem>>, %arg7: memref<1x128xf32, #tpu.memory_space<vmem>>, %arg8: memref<128x64xbf16, #tpu.memory_space<vmem>>, %arg9: memref<1x64xf32, #tpu.memory_space<vmem>>, %arg10: memref<64x32xbf16, #tpu.memory_space<vmem>>, %arg11: memref<1x32xf32, #tpu.memory_space<vmem>>, %arg12: memref<32x128xbf16, #tpu.memory_space<vmem>>, %arg13: memref<1x128xf32, #tpu.memory_space<vmem>>, %arg14: memref<8x128xf32, #tpu.memory_space<vmem>>) attributes {dimension_semantics = [#tpu.dimension_semantics<parallel>], iteration_bounds = array<i64: 1>, scalar_prefetch = 0 : i64, scratch_operands = 0 : i64, tpu.core_type = #tpu.core_type<tc>, window_params = [{transform_indices = @transform_0, window_bounds = array<i64: 8, 784>}, {pipeline_mode = #tpu.pipeline_mode<synchronous>, transform_indices = @transform_1, window_bounds = array<i64: 784, 640>}, {pipeline_mode = #tpu.pipeline_mode<synchronous>, transform_indices = @transform_2, window_bounds = array<i64: 1, 640>}, {pipeline_mode = #tpu.pipeline_mode<synchronous>, transform_indices = @transform_3, window_bounds = array<i64: 640, 256>}, {pipeline_mode = #tpu.pipeline_mode<synchronous>, transform_indices = @transform_4, window_bounds = array<i64: 1, 256>}, {pipeline_mode = #tpu.pipeline_mode<synchronous>, transform_indices = @transform_5, window_bounds = array<i64: 256, 128>}, {pipeline_mode = #tpu.pipeline_mode<synchronous>, transform_indices = @transform_6, window_bounds = array<i64: 1, 128>}, {pipeline_mode = #tpu.pipeline_mode<synchronous>, transform_indices = @transform_7, window_bounds = array<i64: 128, 64>}, {pipeline_mode = #tpu.pipeline_mode<synchronous>, transform_indices = @transform_8, window_bounds = array<i64: 1, 64>}, {pipeline_mode = #tpu.pipeline_mode<synchronous>, transform_indices = @transform_9, window_bounds = array<i64: 64, 32>}, {pipeline_mode = #tpu.pipeline_mode<synchronous>, transform_indices = @transform_10, window_bounds = array<i64: 1, 32>}, {pipeline_mode = #tpu.pipeline_mode<synchronous>, transform_indices = @transform_11, window_bounds = array<i64: 32, 128>}, {pipeline_mode = #tpu.pipeline_mode<synchronous>, transform_indices = @transform_12, window_bounds = array<i64: 1, 128>}, {transform_indices = @transform_13, window_bounds = array<i64: 8, 128>}]} {
    %c0 = arith.constant 0 : index
    %c0_0 = arith.constant 0 : index
    %0 = vector.load %arg1[%c0, %c0_0] : memref<8x784xbf16, #tpu.memory_space<vmem>>, vector<8x784xbf16>
    %c0_1 = arith.constant 0 : index
    %c0_2 = arith.constant 0 : index
    %1 = vector.load %arg2[%c0_1, %c0_2] : memref<784x640xbf16, #tpu.memory_space<vmem>>, vector<784x640xbf16>
    %cst = arith.constant dense<0.000000e+00> : vector<8x640xf32>
    %2 = tpu.matmul %0, %1, %cst {dimension_numbers = #tpu.dot_dimension_numbers<[1], [0], [0], [1], [0, 0, 1, 1], [], []>} : vector<8x784xbf16>, vector<784x640xbf16>, vector<8x640xf32> -> vector<8x640xf32>
    %c0_3 = arith.constant 0 : index
    %c0_4 = arith.constant 0 : index
    %3 = vector.load %arg3[%c0_3, %c0_4] : memref<1x640xf32, #tpu.memory_space<vmem>>, vector<1x640xf32>
    %4 = vector.broadcast %3 : vector<1x640xf32> to vector<8x640xf32>
    %5 = arith.addf %2, %4 : vector<8x640xf32>
    %cst_5 = arith.constant 0.000000e+00 : f32
    %6 = vector.broadcast %cst_5 : f32 to vector<8x640xf32>
    %7 = arith.maximumf %5, %6 : vector<8x640xf32>
    %8 = arith.truncf %7 : vector<8x640xf32> to vector<8x640xbf16>
    %c0_6 = arith.constant 0 : index
    %c0_7 = arith.constant 0 : index
    %9 = vector.load %arg4[%c0_6, %c0_7] : memref<640x256xbf16, #tpu.memory_space<vmem>>, vector<640x256xbf16>
    %cst_8 = arith.constant dense<0.000000e+00> : vector<8x256xf32>
    %10 = tpu.matmul %8, %9, %cst_8 {dimension_numbers = #tpu.dot_dimension_numbers<[1], [0], [0], [1], [0, 0, 1, 1], [], []>} : vector<8x640xbf16>, vector<640x256xbf16>, vector<8x256xf32> -> vector<8x256xf32>
    %c0_9 = arith.constant 0 : index
    %c0_10 = arith.constant 0 : index
    %11 = vector.load %arg5[%c0_9, %c0_10] : memref<1x256xf32, #tpu.memory_space<vmem>>, vector<1x256xf32>
    %12 = vector.broadcast %11 : vector<1x256xf32> to vector<8x256xf32>
    %13 = arith.addf %10, %12 : vector<8x256xf32>
    %cst_11 = arith.constant 0.000000e+00 : f32
    %14 = vector.broadcast %cst_11 : f32 to vector<8x256xf32>
    %15 = arith.maximumf %13, %14 : vector<8x256xf32>
    %16 = arith.truncf %15 : vector<8x256xf32> to vector<8x256xbf16>
    %c0_12 = arith.constant 0 : index
    %c0_13 = arith.constant 0 : index
    %17 = vector.load %arg6[%c0_12, %c0_13] : memref<256x128xbf16, #tpu.memory_space<vmem>>, vector<256x128xbf16>
    %cst_14 = arith.constant dense<0.000000e+00> : vector<8x128xf32>
    %18 = tpu.matmul %16, %17, %cst_14 {dimension_numbers = #tpu.dot_dimension_numbers<[1], [0], [0], [1], [0, 0, 1, 1], [], []>} : vector<8x256xbf16>, vector<256x128xbf16>, vector<8x128xf32> -> vector<8x128xf32>
    %c0_15 = arith.constant 0 : index
    %c0_16 = arith.constant 0 : index
    %19 = vector.load %arg7[%c0_15, %c0_16] : memref<1x128xf32, #tpu.memory_space<vmem>>, vector<1x128xf32>
    %20 = vector.broadcast %19 : vector<1x128xf32> to vector<8x128xf32>
    %21 = arith.addf %18, %20 : vector<8x128xf32>
    %cst_17 = arith.constant 0.000000e+00 : f32
    %22 = vector.broadcast %cst_17 : f32 to vector<8x128xf32>
    %23 = arith.maximumf %21, %22 : vector<8x128xf32>
    %24 = arith.truncf %23 : vector<8x128xf32> to vector<8x128xbf16>
    %c0_18 = arith.constant 0 : index
    %c0_19 = arith.constant 0 : index
    %25 = vector.load %arg8[%c0_18, %c0_19] : memref<128x64xbf16, #tpu.memory_space<vmem>>, vector<128x64xbf16>
    %cst_20 = arith.constant dense<0.000000e+00> : vector<8x64xf32>
    %26 = tpu.matmul %24, %25, %cst_20 {dimension_numbers = #tpu.dot_dimension_numbers<[1], [0], [0], [1], [0, 0, 1, 1], [], []>} : vector<8x128xbf16>, vector<128x64xbf16>, vector<8x64xf32> -> vector<8x64xf32>
    %c0_21 = arith.constant 0 : index
    %c0_22 = arith.constant 0 : index
    %27 = vector.load %arg9[%c0_21, %c0_22] : memref<1x64xf32, #tpu.memory_space<vmem>>, vector<1x64xf32>
    %28 = vector.broadcast %27 : vector<1x64xf32> to vector<8x64xf32>
    %29 = arith.addf %26, %28 : vector<8x64xf32>
    %cst_23 = arith.constant 0.000000e+00 : f32
    %30 = vector.broadcast %cst_23 : f32 to vector<8x64xf32>
    %31 = arith.maximumf %29, %30 : vector<8x64xf32>
    %32 = arith.truncf %31 : vector<8x64xf32> to vector<8x64xbf16>
    %c0_24 = arith.constant 0 : index
    %c0_25 = arith.constant 0 : index
    %33 = vector.load %arg10[%c0_24, %c0_25] : memref<64x32xbf16, #tpu.memory_space<vmem>>, vector<64x32xbf16>
    %cst_26 = arith.constant dense<0.000000e+00> : vector<8x32xf32>
    %34 = tpu.matmul %32, %33, %cst_26 {dimension_numbers = #tpu.dot_dimension_numbers<[1], [0], [0], [1], [0, 0, 1, 1], [], []>} : vector<8x64xbf16>, vector<64x32xbf16>, vector<8x32xf32> -> vector<8x32xf32>
    %c0_27 = arith.constant 0 : index
    %c0_28 = arith.constant 0 : index
    %35 = vector.load %arg11[%c0_27, %c0_28] : memref<1x32xf32, #tpu.memory_space<vmem>>, vector<1x32xf32>
    %36 = vector.broadcast %35 : vector<1x32xf32> to vector<8x32xf32>
    %37 = arith.addf %34, %36 : vector<8x32xf32>
    %38 = math.absf %37 : vector<8x32xf32>
    %cst_29 = arith.constant 0.000000e+00 : f32
    %39 = vector.broadcast %cst_29 : f32 to vector<8x32xf32>
    %40 = arith.subf %39, %38 : vector<8x32xf32>
    %41 = math.exp %40 : vector<8x32xf32>
    %cst_30 = arith.constant 1.000000e+00 : f32
    %42 = vector.broadcast %cst_30 : f32 to vector<8x32xf32>
    %43 = arith.addf %42, %41 : vector<8x32xf32>
    %44 = tpu.reciprocal %43 {approx = true} : vector<8x32xf32> -> vector<8x32xf32>
    %cst_31 = arith.constant 0.000000e+00 : f32
    %45 = vector.broadcast %cst_31 : f32 to vector<8x32xf32>
    %46 = arith.cmpf oge, %37, %45 : vector<8x32xf32>
    %47 = arith.mulf %41, %44 : vector<8x32xf32>
    %48 = arith.select %46, %44, %47 : vector<8x32xi1>, vector<8x32xf32>
    %49 = arith.truncf %48 : vector<8x32xf32> to vector<8x32xbf16>
    %c0_32 = arith.constant 0 : index
    %c0_33 = arith.constant 0 : index
    %50 = vector.load %arg12[%c0_32, %c0_33] : memref<32x128xbf16, #tpu.memory_space<vmem>>, vector<32x128xbf16>
    %cst_34 = arith.constant dense<0.000000e+00> : vector<8x128xf32>
    %51 = tpu.matmul %49, %50, %cst_34 {dimension_numbers = #tpu.dot_dimension_numbers<[1], [0], [0], [1], [0, 0, 1, 1], [], []>} : vector<8x32xbf16>, vector<32x128xbf16>, vector<8x128xf32> -> vector<8x128xf32>
    %c0_35 = arith.constant 0 : index
    %c0_36 = arith.constant 0 : index
    %52 = vector.load %arg13[%c0_35, %c0_36] : memref<1x128xf32, #tpu.memory_space<vmem>>, vector<1x128xf32>
    %53 = vector.broadcast %52 : vector<1x128xf32> to vector<8x128xf32>
    %54 = arith.addf %51, %53 : vector<8x128xf32>
    %cst_37 = arith.constant dense<0xFF800000> : vector<8xf32>
    %55 = vector.multi_reduction <maximumf>, %54, %cst_37 [1] : vector<8x128xf32> to vector<8xf32>
    %56 = vector.shape_cast %55 : vector<8xf32> to vector<8x1xf32>
    %57 = vector.broadcast %56 : vector<8x1xf32> to vector<8x128xf32>
    %58 = arith.subf %54, %57 : vector<8x128xf32>
    %59 = math.exp %58 : vector<8x128xf32>
    %cst_38 = arith.constant dense<0.000000e+00> : vector<8xf32>
    %60 = vector.multi_reduction <add>, %59, %cst_38 [1] : vector<8x128xf32> to vector<8xf32>
    %61 = vector.shape_cast %60 : vector<8xf32> to vector<8x1xf32>
    %62 = tpu.reciprocal %61 {approx = true} : vector<8x1xf32> -> vector<8x1xf32>
    %63 = vector.broadcast %62 : vector<8x1xf32> to vector<8x128xf32>
    %64 = arith.mulf %59, %63 : vector<8x128xf32>
    %c0_39 = arith.constant 0 : index
    %c0_40 = arith.constant 0 : index
    %65 = vector.load %arg14[%c0_39, %c0_40] : memref<8x128xf32, #tpu.memory_space<vmem>>, vector<8x128xf32>
    tpu.vector_store %arg14[%c0_39, %c0_40], %64 {strides = array<i32>} : memref<8x128xf32, #tpu.memory_space<vmem>>, vector<8x128xf32>,
    return
  }
  func.func @transform_0(%arg0: i32) -> (i32, i32) {
    %c0_i32 = arith.constant 0 : i32
    %c0_i32_0 = arith.constant 0 : i32
    return %arg0, %c0_i32 : i32, i32
  }
  func.func @transform_1(%arg0: i32) -> (i32, i32) {
    %c0_i32 = arith.constant 0 : i32
    %c0_i32_0 = arith.constant 0 : i32
    %c0_i32_1 = arith.constant 0 : i32
    return %c0_i32, %c0_i32_0 : i32, i32
  }
  func.func @transform_2(%arg0: i32) -> (i32, i32) {
    %c0_i32 = arith.constant 0 : i32
    %c0_i32_0 = arith.constant 0 : i32
    %c0_i32_1 = arith.constant 0 : i32
    return %c0_i32, %c0_i32_0 : i32, i32
  }
  func.func @transform_3(%arg0: i32) -> (i32, i32) {
    %c0_i32 = arith.constant 0 : i32
    %c0_i32_0 = arith.constant 0 : i32
    %c0_i32_1 = arith.constant 0 : i32
    return %c0_i32, %c0_i32_0 : i32, i32
  }
  func.func @transform_4(%arg0: i32) -> (i32, i32) {
    %c0_i32 = arith.constant 0 : i32
    %c0_i32_0 = arith.constant 0 : i32
    %c0_i32_1 = arith.constant 0 : i32
    return %c0_i32, %c0_i32_0 : i32, i32
  }
  func.func @transform_5(%arg0: i32) -> (i32, i32) {
    %c0_i32 = arith.constant 0 : i32
    %c0_i32_0 = arith.constant 0 : i32
    %c0_i32_1 = arith.constant 0 : i32
    return %c0_i32, %c0_i32_0 : i32, i32
  }
  func.func @transform_6(%arg0: i32) -> (i32, i32) {
    %c0_i32 = arith.constant 0 : i32
    %c0_i32_0 = arith.constant 0 : i32
    %c0_i32_1 = arith.constant 0 : i32
    return %c0_i32, %c0_i32_0 : i32, i32
  }
  func.func @transform_7(%arg0: i32) -> (i32, i32) {
    %c0_i32 = arith.constant 0 : i32
    %c0_i32_0 = arith.constant 0 : i32
    %c0_i32_1 = arith.constant 0 : i32
    return %c0_i32, %c0_i32_0 : i32, i32
  }
  func.func @transform_8(%arg0: i32) -> (i32, i32) {
    %c0_i32 = arith.constant 0 : i32
    %c0_i32_0 = arith.constant 0 : i32
    %c0_i32_1 = arith.constant 0 : i32
    return %c0_i32, %c0_i32_0 : i32, i32
  }
  func.func @transform_9(%arg0: i32) -> (i32, i32) {
    %c0_i32 = arith.constant 0 : i32
    %c0_i32_0 = arith.constant 0 : i32
    %c0_i32_1 = arith.constant 0 : i32
    return %c0_i32, %c0_i32_0 : i32, i32
  }
  func.func @transform_10(%arg0: i32) -> (i32, i32) {
    %c0_i32 = arith.constant 0 : i32
    %c0_i32_0 = arith.constant 0 : i32
    %c0_i32_1 = arith.constant 0 : i32
    return %c0_i32, %c0_i32_0 : i32, i32
  }
  func.func @transform_11(%arg0: i32) -> (i32, i32) {
    %c0_i32 = arith.constant 0 : i32
    %c0_i32_0 = arith.constant 0 : i32
    %c0_i32_1 = arith.constant 0 : i32
    return %c0_i32, %c0_i32_0 : i32, i32
  }
  func.func @transform_12(%arg0: i32) -> (i32, i32) {
    %c0_i32 = arith.constant 0 : i32
    %c0_i32_0 = arith.constant 0 : i32
    %c0_i32_1 = arith.constant 0 : i32
    return %c0_i32, %c0_i32_0 : i32, i32
  }
  func.func @transform_13(%arg0: i32) -> (i32, i32) {
    %c0_i32 = arith.constant 0 : i32
    %c0_i32_0 = arith.constant 0 : i32
    return %arg0, %c0_i32 : i32, i32
  }
}

</mosaic_0001>

<bundles_post_ra>
// kernel: feed_forward_nn.1
= control target key start
LH: loop header
LB: loop body
LE: loop exit
PB: predicated region body
PF: predicated region fallthrough
CT: control target
= control target key end

     0   :  { %18 = vsyncpa [#allocation3], 0  ;;  %s4743_s0 = inlined_call_operand.vmem [shape: bf16[8,784], index: 0, kind: input, shape index: {}]   ;;  %s4744_s1 = inlined_call_operand.hbm [shape: bf16[784,640], index: 1, kind: input, shape index: {}]   ;;  %s4745_s2 = inlined_call_operand.vmem [shape: f32[1,640], index: 2, kind: input, shape index: {}]   ;;  %s4746_s3 = inlined_call_operand.hbm [shape: bf16[640,256], index: 3, kind: input, shape index: {}]   ;;  %s4747_s4 = inlined_call_operand.vmem [shape: f32[1,256], index: 4, kind: input, shape index: {}]   ;;  %s4748_s5 = inlined_call_operand.vmem [shape: bf16[256,128], index: 5, kind: input, shape index: {}]   ;;  %s4749_s6 = inlined_call_operand.vmem [shape: f32[1,128], index: 6, kind: input, shape index: {}]   ;;  %s4750_s7 = inlined_call_operand.vmem [shape: bf16[128,64], index: 7, kind: input, shape index: {}]   ;;  %s4751_s8 = inlined_call_operand.vmem [shape: f32[1,64], index: 8, kind: input, shape index: {}]   ;;  %s4752_s9 = inlined_call_operand.vmem [shape: bf16[64,32], index: 9, kind: input, shape index: {}]   ;;  %s4753_s10 = inlined_call_operand.vmem [shape: f32[1,32], index: 10, kind: input, shape index: {}]   ;;  %s4754_s11 = inlined_call_operand.vmem [shape: bf16[32,128], index: 11, kind: input, shape index: {}]   ;;  %s4755_s12 = inlined_call_operand.vmem [shape: f32[1,128], index: 12, kind: input, shape index: {}]   ;;  %s4756_s13 = inlined_call_operand.vmem [shape: f32[8,128], index: 13, kind: output, shape index: {}]  }
   0x1   :  { %19 = vsyncpa [#allocation5], 0  ;;  %s4409_s25 = smov [#allocation2]   ;;  %s4361_s29 = scalar_lea.hbm %s4744_s1, 31360 }
   0x2   :  { %s27_s26 = sshll.u32 %s4409_s25, 4  ;;  %p4362_p0 = scmp.ne.s32.totalorder %s4744_s1, %s4361_s29  ;;  %s28_s26 = int_to_ptr.vmem [resolvable:$true] %s27_s26 }
   0x3   :  { %p4365_p1 = scmp.lt.u32.totalorder %s4361_s29, %s4744_s1 }
   0x5   :  { %p4367_p2 = pnand %p4365_p1, %p4362_p0 }
   0x7   :  { %4370 = shalt.err (!%p4367_p2)
}
   0x8   :  { %s4371_s17 = scalar_lea.vmem %s28_s26, 31360  ;;  %p4376_p4 = scmp.lt.s32.totalorder %s28_s26, %s28_s26 }
   0x9   :  { %p4372_p3 = scmp.ne.s32.totalorder %s28_s26, %s4371_s17  ;;  %p4377_p5 = scmp.lt.s32.totalorder %s4371_s17, %s4371_s17 }
   0xb   :  { %p4378_p6 = por %p4377_p5, %p4376_p4 }
   0xd   :  { %p4379_p7 = pnand %p4378_p6, %p4372_p3 }
   0xf   :  { %4382 = shalt.err (!%p4379_p7)
}
  0x10   :  { %s4410_s18 = smov 320   ;;  %s4411_s19 = smov 20  }
  0x11   :  { %33 = dma.hbm_to_vmem [thread:$0]  %s4744_s1, 31360, %s28_s26, [#allocation3], %s4410_s18, %s4410_s18, %s4411_s19  }
  0x12   :  { %s4412_s22 = smov [#allocation4]   ;;  %s4383_s27 = scalar_lea.hbm %s4746_s3, 10240 }
  0x13   :  { %s41_s23 = sshll.u32 %s4412_s22, 4  ;;  %p4384_p8 = scmp.ne.s32.totalorder %s4746_s3, %s4383_s27  ;;  %s42_s23 = int_to_ptr.vmem [resolvable:$true] %s41_s23 }
  0x14   :  { %p4387_p9 = scmp.lt.u32.totalorder %s4383_s27, %s4746_s3 }
  0x16   :  { %p4389_p10 = pnand %p4387_p9, %p4384_p8 }
  0x18   :  { %4392 = shalt.err (!%p4389_p10)
}
  0x19   :  { %s4393_s15 = scalar_lea.vmem %s42_s23, 10240  ;;  %p4398_p12 = scmp.lt.s32.totalorder %s42_s23, %s42_s23 }
  0x1a   :  { %p4394_p11 = scmp.ne.s32.totalorder %s42_s23, %s4393_s15  ;;  %p4399_p13 = scmp.lt.s32.totalorder %s4393_s15, %s4393_s15 }
  0x1c   :  { %p4400_p0 = por %p4399_p13, %p4398_p12 }
  0x1e   :  { %p4401_p1 = pnand %p4400_p0, %p4394_p11 }
  0x20   :  { %4404 = shalt.err (!%p4401_p1)
}
  0x21   :  { %s4413_s1 = smov 128   ;;  %s4414_s26 = smov 8  }
  0x22   :  { %47 = dma.hbm_to_vmem [thread:$0]  %s4746_s3, 10240, %s42_s23, [#allocation5], %s4413_s1, %s4413_s1, %s4414_s26  }
  0x23   :  { %4405 = dma.done.wait [#allocation3], 31360  }
  0x24   :  { %4406 = vsyncadd [#allocation3], 4294935936 }
  0x25   :  { %4407 = dma.done.wait [#allocation5], 10240  }
  0x26   :  { %4408 = vsyncadd [#allocation5], 4294957056  ;;  %v4415_v0 = vmov 0   ;;  %v3852_v1 = vld [vmem:[#allocation2 + $0x4] ss:$20 sps:$4 sm:$0xff]   ;;  %vm1696_vm0 = vcmask 130048  }
  0x27   :  { %1855 = vmatprep.mubr.bf16.mxu1 %v4415_v0  ;;  %v3854_v2 = vld [vmem:[#allocation2 + $0x784] ss:$20 sps:$4 sm:$0xff]   ;;  %1700 = vmatprep.subr.bf16.mxu0 %v3852_v1  ;;  %v3856_v3 = vld [vmem:[#allocation2] ss:$20 sps:$4 sm:$0xff]   ;;  %v3860_v6 = vld [vmem:[#allocation2 + $0x8] ss:$20 sps:$4 sm:$0xff]  }
  0x28   :  { %v3857_v4 = vld [vmem:[#allocation2 + $0x780] ss:$20 sps:$4 sm:$0xff]   ;;  %1823 = vmatprep.subr.bf16.mxu1 %v3854_v2  ;;  %1701 = vmatpush1.bf16.msra.mxu0 %v3856_v3  ;;  %v3863_v8 = vld [vmem:[#allocation2 + $0x28] ss:$20 sps:$4 sm:$0xff]   ;;  %v3864_v9 = vld [vmem:[%s4743_s0 + $0x18] ss:$0 sps:$4 sm:$0xff]  }
  0x29   :  { %v3858_v5 = vld [vmem:[#allocation2 + $0x2c] ss:$20 sps:$4 sm:$0xff]   ;;  %1824 = vmatpush1.bf16.msra.mxu1 %v3857_v4  ;;  %v3865_v10 = vld [vmem:[#allocation2 + $0x54] ss:$20 sps:$4 sm:$0xff]   ;;  %v3867_v11 = vld [vmem:[#allocation2 + $0x30] ss:$20 sps:$4 sm:$0xff]  }
  0x2a   :  { %v3862_v7 = vld [vmem:[#allocation2 + $0xc] ss:$20 sps:$4 sm:$0xff]   ;;  %1702 = vmatprep.subr.bf16.mxu0 %v3858_v5  ;;  %v3869_v12 = vld [vmem:[#allocation2 + $0x34] ss:$20 sps:$4 sm:$0xff]   ;;  %v3870_v13 = vld [vmem:[#allocation2 + $0x50] ss:$20 sps:$4 sm:$0xff]  }
  0x2b   :  { %1864 = vmatprep.subr.bf16.mxu1 %v3862_v7  ;;  %v3871_v14 = vld [vmem:[#allocation2 + $0x7c] ss:$20 sps:$4 sm:$0xff]   ;;  %v3873_v16 = vld [vmem:[#allocation2 + $0x58] ss:$20 sps:$4 sm:$0xff]   ;;  %v3879_v20 = vld [vmem:[#allocation2 + $0x80] ss:$20 sps:$4 sm:$0xff]  }
  0x2c   :  { %3535 = vmatmul.mubr.msk.bf16.vlgmr.msra.gmra.mrb[0].mxu1 %vm1696_vm0, %v3864_v9  ;;  %1703 = vmatpush1.bf16.msra.mxu0 %v3863_v8  ;;  %v3875_v15 = vld [vmem:[#allocation2 + $0x5c] ss:$20 sps:$4 sm:$0xff]   ;;  %v3876_v17 = vld [vmem:[#allocation2 + $0x78] ss:$20 sps:$4 sm:$0xff]   ;;  %v3882_v21 = vld [vmem:[#allocation2 + $0xa0] ss:$20 sps:$4 sm:$0xff]  }
  0x2d   :  { %1865 = vmatpush1.bf16.msra.mxu1 %v3860_v6  ;;  %1704 = vmatprep.subr.bf16.mxu0 %v3865_v10  ;;  %v3877_v18 = vld [vmem:[#allocation2 + $0xa4] ss:$20 sps:$4 sm:$0xff]   ;;  %v3883_v22 = vld [vmem:[#allocation2 + $0xcc] ss:$20 sps:$4 sm:$0xff]   ;;  %v3885_v24 = vld [vmem:[#allocation2 + $0xa8] ss:$20 sps:$4 sm:$0xff]  }
  0x2e   :  { %1866 = vmatprep.subr.bf16.mxu1 %v3869_v12  ;;  %v3881_v19 = vld [vmem:[#allocation2 + $0x84] ss:$20 sps:$4 sm:$0xff]   ;;  %v3887_v23 = vld [vmem:[#allocation2 + $0xac] ss:$20 sps:$4 sm:$0xff]   ;;  %v3888_v25 = vld [vmem:[#allocation2 + $0xc8] ss:$20 sps:$4 sm:$0xff]  }
  0x2f   :  { %v3889_v26 = vld [vmem:[#allocation2 + $0xf4] ss:$20 sps:$4 sm:$0xff]   ;;  %v3891_v28 = vld [vmem:[#allocation2 + $0xd0] ss:$20 sps:$4 sm:$0xff]   ;;  %v3897_v32 = vld [vmem:[#allocation2 + $0xf8] ss:$20 sps:$4 sm:$0xff]  }
  0x30   :  { %1705 = vmatpush1.bf16.msra.mxu0 %v3870_v13  ;;  %v3893_v27 = vld [vmem:[#allocation2 + $0xd4] ss:$20 sps:$4 sm:$0xff]   ;;  %v3894_v29 = vld [vmem:[#allocation2 + $0xf0] ss:$20 sps:$4 sm:$0xff]   ;;  %v3900_v33 = vld [vmem:[#allocation2 + $0x118] ss:$20 sps:$4 sm:$0xff]  }
  0x31   :  { %1867 = vmatpush1.bf16.msra.mxu1 %v3867_v11  ;;  %1706 = vmatprep.subr.bf16.mxu0 %v3871_v14  ;;  %v3895_v30 = vld [vmem:[#allocation2 + $0x11c] ss:$20 sps:$4 sm:$0xff]   ;;  %v3901_v34 = vld [vmem:[#allocation2 + $0x144] ss:$20 sps:$4 sm:$0xff]   ;;  %v3903_v36 = vld [vmem:[#allocation2 + $0x120] ss:$20 sps:$4 sm:$0xff]  }
  0x32   :  { %1868 = vmatprep.subr.bf16.mxu1 %v3875_v15  ;;  %v3899_v31 = vld [vmem:[#allocation2 + $0xfc] ss:$20 sps:$4 sm:$0xff]   ;;  %v3905_v35 = vld [vmem:[#allocation2 + $0x124] ss:$20 sps:$4 sm:$0xff]   ;;  %v3906_v37 = vld [vmem:[#allocation2 + $0x140] ss:$20 sps:$4 sm:$0xff]  }
  0x33   :  { %v3907_v38 = vld [vmem:[#allocation2 + $0x16c] ss:$20 sps:$4 sm:$0xff]   ;;  %v3909_v40 = vld [vmem:[#allocation2 + $0x148] ss:$20 sps:$4 sm:$0xff]   ;;  %v3915_v44 = vld [vmem:[#allocation2 + $0x170] ss:$20 sps:$4 sm:$0xff]  }
  0x34   :  { %1707 = vmatpush1.bf16.msra.mxu0 %v3876_v17  ;;  %v3911_v39 = vld [vmem:[#allocation2 + $0x14c] ss:$20 sps:$4 sm:$0xff]   ;;  %v3912_v41 = vld [vmem:[#allocation2 + $0x168] ss:$20 sps:$4 sm:$0xff]   ;;  %v3918_v45 = vld [vmem:[#allocation2 + $0x190] ss:$20 sps:$4 sm:$0xff]  }
  0x35   :  { %1869 = vmatpush1.bf16.msra.mxu1 %v3873_v16  ;;  %1708 = vmatprep.subr.bf16.mxu0 %v3877_v18  ;;  %v3913_v42 = vld [vmem:[#allocation2 + $0x194] ss:$20 sps:$4 sm:$0xff]   ;;  %v3919_v46 = vld [vmem:[#allocation2 + $0x1bc] ss:$20 sps:$4 sm:$0xff]   ;;  %v3921_v48 = vld [vmem:[#allocation2 + $0x198] ss:$20 sps:$4 sm:$0xff]  }
  0x36   :  { %1870 = vmatprep.subr.bf16.mxu1 %v3881_v19  ;;  %v3917_v43 = vld [vmem:[#allocation2 + $0x174] ss:$20 sps:$4 sm:$0xff]   ;;  %v3923_v47 = vld [vmem:[#allocation2 + $0x19c] ss:$20 sps:$4 sm:$0xff]   ;;  %v73_v49 = vld [vmem:[%s4743_s0] sm:$0xff]  ;;  %vm4417_vm1 = vmmov 0  }
  0x37   :  { %v3924_v50 = vld [vmem:[#allocation2 + $0x1b8] ss:$20 sps:$4 sm:$0xff]   ;;  %v4520_v52 = vcombine.high %v73_v49, %v73_v49  ;;  %v3927_v54 = vld [vmem:[#allocation2 + $0x1c0] ss:$20 sps:$4 sm:$0xff]   ;;  %v3933_v58 = vld [vmem:[#allocation2 + $0x1e8] ss:$20 sps:$4 sm:$0xff]   ;;  %v4524_v8 = vcombine.low %v73_v49, %v73_v49 }
  0x38   :  { %1709 = vmatpush1.bf16.msra.mxu0 %v3882_v21  ;;  %v3925_v51 = vld [vmem:[#allocation2 + $0x1e4] ss:$20 sps:$4 sm:$0xff]   ;;  %v3930_v55 = vld [vmem:[#allocation2 + $0x1e0] ss:$20 sps:$4 sm:$0xff]   ;;  %v3936_v59 = vld [vmem:[#allocation2 + $0x208] ss:$20 sps:$4 sm:$0xff]  }
  0x39   :  { %1871 = vmatpush1.bf16.msra.mxu1 %v3879_v20  ;;  %1710 = vmatprep.subr.bf16.mxu0 %v3883_v22  ;;  %v3929_v53 = vld [vmem:[#allocation2 + $0x1c4] ss:$20 sps:$4 sm:$0xff]   ;;  %v3931_v56 = vld [vmem:[#allocation2 + $0x20c] ss:$20 sps:$4 sm:$0xff]   ;;  %v3937_v60 = vld [vmem:[#allocation2 + $0x234] ss:$20 sps:$4 sm:$0xff]  }
  0x3a   :  { %1872 = vmatprep.subr.bf16.mxu1 %v3887_v23  ;;  %1732 = vmatprep.mubr.bf16.mxu0 %v4520_v52  ;;  %v3935_v57 = vld [vmem:[#allocation2 + $0x1ec] ss:$20 sps:$4 sm:$0xff]   ;;  %v3941_v61 = vld [vmem:[#allocation2 + $0x214] ss:$20 sps:$4 sm:$0xff]   ;;  %v3939_v62 = vld [vmem:[#allocation2 + $0x210] ss:$20 sps:$4 sm:$0xff]  }
  0x3b   :  { %1896 = vmatprep.mubr.bf16.mxu1 %v4520_v52  ;;  %v3942_v63 = vld [vmem:[#allocation2 + $0x230] ss:$20 sps:$4 sm:$0xff]   ;;  %v3945_v3 = vld [vmem:[#allocation2 + $0x238] ss:$20 sps:$4 sm:$0xff]   ;;  %v3950_v7 = vld [vmem:[#allocation2 + $0x280] ss:$20 sps:$4 sm:$0xff]  }
  0x3c   :  { %1711 = vmatpush1.bf16.msra.mxu0 %v3888_v25  ;;  %v3943_v1 = vld [vmem:[#allocation2 + $0x25c] ss:$20 sps:$4 sm:$0xff]   ;;  %v3948_v4 = vld [vmem:[#allocation2 + $0x258] ss:$20 sps:$4 sm:$0xff]   ;;  %v3953_v9 = vld [vmem:[#allocation2 + $0x260] ss:$20 sps:$4 sm:$0xff]  }
  0x3d   :  { %1873 = vmatpush1.bf16.msra.mxu1 %v3885_v24  ;;  %1712 = vmatprep.subr.bf16.mxu0 %v3889_v26  ;;  %v3947_v2 = vld [vmem:[#allocation2 + $0x23c] ss:$20 sps:$4 sm:$0xff]   ;;  %v3952_v5 = vld [vmem:[#allocation2 + $0x284] ss:$20 sps:$4 sm:$0xff]   ;;  %v3959_v10 = vld [vmem:[#allocation2 + $0x2ac] ss:$20 sps:$4 sm:$0xff]  }
  0x3e   :  { %1874 = vmatprep.subr.bf16.mxu1 %v3893_v27  ;;  %v3955_v6 = vld [vmem:[#allocation2 + $0x264] ss:$20 sps:$4 sm:$0xff]   ;;  %v3962_v11 = vld [vmem:[#allocation2 + $0x28c] ss:$20 sps:$4 sm:$0xff]   ;;  %v3957_v12 = vld [vmem:[#allocation2 + $0x2a8] ss:$20 sps:$4 sm:$0xff]  }
  0x3f   :  { %v3960_v13 = vld [vmem:[#allocation2 + $0x288] ss:$20 sps:$4 sm:$0xff]   ;;  %v3963_v16 = vld [vmem:[#allocation2 + $0x2d0] ss:$20 sps:$4 sm:$0xff]   ;;  %v3969_v20 = vld [vmem:[#allocation2 + $0x2f8] ss:$20 sps:$4 sm:$0xff]  }
  0x40   :  { %1713 = vmatpush1.bf16.msra.mxu0 %v3894_v29  ;;  %v3965_v14 = vld [vmem:[#allocation2 + $0x2d4] ss:$20 sps:$4 sm:$0xff]   ;;  %v3966_v17 = vld [vmem:[#allocation2 + $0x2b0] ss:$20 sps:$4 sm:$0xff]   ;;  %v3972_v21 = vld [vmem:[#allocation2 + $0x2d8] ss:$20 sps:$4 sm:$0xff]  }
  0x41   :  { %1875 = vmatpush1.bf16.msra.mxu1 %v3891_v28  ;;  %1714 = vmatprep.subr.bf16.mxu0 %v3895_v30  ;;  %v3968_v15 = vld [vmem:[#allocation2 + $0x2b4] ss:$20 sps:$4 sm:$0xff]   ;;  %v3971_v18 = vld [vmem:[#allocation2 + $0x2fc] ss:$20 sps:$4 sm:$0xff]   ;;  %v3977_v22 = vld [vmem:[#allocation2 + $0x324] ss:$20 sps:$4 sm:$0xff]  }
  0x42   :  { %1876 = vmatprep.subr.bf16.mxu1 %v3899_v31  ;;  %v3974_v19 = vld [vmem:[#allocation2 + $0x2dc] ss:$20 sps:$4 sm:$0xff]   ;;  %v3980_v23 = vld [vmem:[#allocation2 + $0x304] ss:$20 sps:$4 sm:$0xff]   ;;  %v3975_v24 = vld [vmem:[#allocation2 + $0x320] ss:$20 sps:$4 sm:$0xff]  }
  0x43   :  { %v3978_v25 = vld [vmem:[#allocation2 + $0x300] ss:$20 sps:$4 sm:$0xff]   ;;  %v3981_v28 = vld [vmem:[#allocation2 + $0x348] ss:$20 sps:$4 sm:$0xff]   ;;  %vm3146_vm2 = vcmask 523264   ;;  %vm3223_vm4 = vcmask 261120  }
  0x44   :  { %1715 = vmatpush1.bf16.msra.mxu0 %v3900_v33  ;;  %v3983_v26 = vld [vmem:[#allocation2 + $0x34c] ss:$20 sps:$4 sm:$0xff]   ;;  %v3984_v29 = vld [vmem:[#allocation2 + $0x328] ss:$20 sps:$4 sm:$0xff]   ;;  %v3987_v33 = vld [vmem:[#allocation2 + $0x370] ss:$20 sps:$4 sm:$0xff]  }
  0x45   :  { %1877 = vmatpush1.bf16.msra.mxu1 %v3897_v32  ;;  %1716 = vmatprep.subr.bf16.mxu0 %v3901_v34  ;;  %v3986_v27 = vld [vmem:[#allocation2 + $0x32c] ss:$20 sps:$4 sm:$0xff]   ;;  %v3989_v30 = vld [vmem:[#allocation2 + $0x374] ss:$20 sps:$4 sm:$0xff]   ;;  %v3990_v34 = vld [vmem:[#allocation2 + $0x350] ss:$20 sps:$4 sm:$0xff]  }
  0x46   :  { %1878 = vmatprep.subr.bf16.mxu1 %v3905_v35  ;;  %v3992_v31 = vld [vmem:[#allocation2 + $0x354] ss:$20 sps:$4 sm:$0xff]  }
  0x47   :  { %v4531_v32 = vld [vmem:[%s4743_s0 + $0x8] sm:$0xff] }
  0x48   :  { %1717 = vmatpush1.bf16.msra.mxu0 %v3906_v37  ;;  %v4535_v35 = vcombine.high %v4531_v32, %v4531_v32  ;;  %v3998_v37 = vld [vmem:[#allocation2 + $0x37c] ss:$20 sps:$4 sm:$0xff]   ;;  %v4016_v49 = vld [vmem:[#allocation2 + $0x3f4] ss:$20 sps:$4 sm:$0xff]  }
  0x49   :  { %1879 = vmatpush1.bf16.msra.mxu1 %v3903_v36  ;;  %1718 = vmatprep.subr.bf16.mxu0 %v3907_v38  ;;  %v3995_v36 = vld [vmem:[#allocation2 + $0x39c] ss:$20 sps:$4 sm:$0xff]   ;;  %v3993_v38 = vld [vmem:[#allocation2 + $0x398] ss:$20 sps:$4 sm:$0xff]  }
  0x4a   :  { %1880 = vmatprep.subr.bf16.mxu1 %v3911_v39  ;;  %v3996_v39 = vld [vmem:[#allocation2 + $0x378] ss:$20 sps:$4 sm:$0xff]  }
  0x4c   :  { %1719 = vmatpush1.bf16.msra.mxu0 %v3912_v41  ;;  %v4004_v41 = vld [vmem:[#allocation2 + $0x3a4] ss:$20 sps:$4 sm:$0xff]  }
  0x4d   :  { %1881 = vmatpush1.bf16.msra.mxu1 %v3909_v40  ;;  %1720 = vmatprep.subr.bf16.mxu0 %v3913_v42  ;;  %v4001_v40 = vld [vmem:[#allocation2 + $0x3c4] ss:$20 sps:$4 sm:$0xff]   ;;  %v3999_v42 = vld [vmem:[#allocation2 + $0x3c0] ss:$20 sps:$4 sm:$0xff]  }
  0x4e   :  { %1882 = vmatprep.subr.bf16.mxu1 %v3917_v43  ;;  %v4002_v43 = vld [vmem:[#allocation2 + $0x3a0] ss:$20 sps:$4 sm:$0xff]  }
  0x50   :  { %1721 = vmatpush1.bf16.msra.mxu0 %v3918_v45  ;;  %v4010_v45 = vld [vmem:[#allocation2 + $0x3cc] ss:$20 sps:$4 sm:$0xff]  }
  0x51   :  { %1883 = vmatpush1.bf16.msra.mxu1 %v3915_v44  ;;  %1722 = vmatprep.subr.bf16.mxu0 %v3919_v46  ;;  %v4007_v44 = vld [vmem:[#allocation2 + $0x3ec] ss:$20 sps:$4 sm:$0xff]   ;;  %v4005_v46 = vld [vmem:[#allocation2 + $0x3e8] ss:$20 sps:$4 sm:$0xff]  }
  0x52   :  { %1884 = vmatprep.subr.bf16.mxu1 %v3923_v47  ;;  %v4008_v47 = vld [vmem:[#allocation2 + $0x3c8] ss:$20 sps:$4 sm:$0xff]  }
  0x54   :  { %1723 = vmatpush1.bf16.msra.mxu0 %v3924_v50  ;;  %v4011_v50 = vld [vmem:[#allocation2 + $0x410] ss:$20 sps:$4 sm:$0xff]  }
  0x55   :  { %1885 = vmatpush1.bf16.msra.mxu1 %v3921_v48  ;;  %1724 = vmatprep.subr.bf16.mxu0 %v3925_v51  ;;  %v4013_v48 = vld [vmem:[#allocation2 + $0x414] ss:$20 sps:$4 sm:$0xff]   ;;  %v4014_v51 = vld [vmem:[#allocation2 + $0x3f0] ss:$20 sps:$4 sm:$0xff]  }
  0x56   :  { %1886 = vmatprep.subr.bf16.mxu1 %v3929_v53  ;;  %v4019_v53 = vld [vmem:[#allocation2 + $0x43c] ss:$20 sps:$4 sm:$0xff]  }
  0x58   :  { %1725 = vmatpush1.bf16.msra.mxu0 %v3930_v55  ;;  %v4017_v55 = vld [vmem:[#allocation2 + $0x438] ss:$20 sps:$4 sm:$0xff]  }
  0x59   :  { %1887 = vmatpush1.bf16.msra.mxu1 %v3927_v54  ;;  %1726 = vmatprep.subr.bf16.mxu0 %v3931_v56  ;;  %v4022_v54 = vld [vmem:[#allocation2 + $0x41c] ss:$20 sps:$4 sm:$0xff]   ;;  %v4020_v56 = vld [vmem:[#allocation2 + $0x418] ss:$20 sps:$4 sm:$0xff]  }
  0x5a   :  { %1888 = vmatprep.subr.bf16.mxu1 %v3935_v57  ;;  %v4025_v57 = vld [vmem:[#allocation2 + $0x464] ss:$20 sps:$4 sm:$0xff]  }
  0x5c   :  { %1727 = vmatpush1.bf16.msra.mxu0 %v3936_v59  ;;  %v4023_v59 = vld [vmem:[#allocation2 + $0x460] ss:$20 sps:$4 sm:$0xff]  }
  0x5d   :  { %1889 = vmatpush1.bf16.msra.mxu1 %v3933_v58  ;;  %1728 = vmatprep.subr.bf16.mxu0 %v3937_v60  ;;  %v4028_v58 = vld [vmem:[#allocation2 + $0x444] ss:$20 sps:$4 sm:$0xff]   ;;  %v4026_v60 = vld [vmem:[#allocation2 + $0x440] ss:$20 sps:$4 sm:$0xff]  }
  0x5e   :  { %1890 = vmatprep.subr.bf16.mxu1 %v3941_v61  ;;  %v4031_v61 = vld [vmem:[#allocation2 + $0x48c] ss:$20 sps:$4 sm:$0xff]  }
  0x60   :  { %1729 = vmatpush1.bf16.msra.mxu0 %v3942_v63  ;;  %v4029_v63 = vld [vmem:[#allocation2 + $0x488] ss:$20 sps:$4 sm:$0xff]  }
  0x61   :  { %1891 = vmatpush1.bf16.msra.mxu1 %v3939_v62  ;;  %1730 = vmatprep.subr.bf16.mxu0 %v3943_v1  ;;  %v4034_v62 = vld [vmem:[#allocation2 + $0x46c] ss:$20 sps:$4 sm:$0xff]   ;;  %v4032_v1 = vld [vmem:[#allocation2 + $0x468] ss:$20 sps:$4 sm:$0xff]  }
  0x62   :  { %1892 = vmatprep.subr.bf16.mxu1 %v3947_v2  ;;  %v4037_v2 = vld [vmem:[#allocation2 + $0x4b4] ss:$20 sps:$4 sm:$0xff]  }
  0x64   :  { %1731 = vmatpush1.bf16.msra.mxu0 %v3948_v4  ;;  %v4035_v4 = vld [vmem:[#allocation2 + $0x4b0] ss:$20 sps:$4 sm:$0xff]  }
  0x65   :  { %1893 = vmatpush1.bf16.msra.mxu1 %v3945_v3  ;;  %1741 = vmatprep.subr.bf16.mxu0 %v3952_v5  ;;  %v4040_v3 = vld [vmem:[#allocation2 + $0x494] ss:$20 sps:$4 sm:$0xff]   ;;  %v4038_v5 = vld [vmem:[#allocation2 + $0x490] ss:$20 sps:$4 sm:$0xff]  }
  0x66   :  { %1894 = vmatprep.subr.bf16.mxu1 %v3955_v6  ;;  %v4043_v6 = vld [vmem:[#allocation2 + $0x4dc] ss:$20 sps:$4 sm:$0xff]  }
  0x67   :  { %1733 = vmatmul.mubr.bf16.vlgmr.msra.gmra.mrb[0].mxu0 %v4524_v8 }
  0x68   :  { %1742 = vmatpush1.bf16.msra.mxu0 %v3950_v7  ;;  %1773 = vmatprep.mubr.bf16.mxu0 %v4535_v35  ;;  %v4046_v7 = vld [vmem:[#allocation2 + $0x4bc] ss:$20 sps:$4 sm:$0xff]  }
  0x69   :  { %1895 = vmatpush1.bf16.msra.mxu1 %v3953_v9  ;;  %1743 = vmatprep.subr.bf16.mxu0 %v3959_v10  ;;  %v4041_v9 = vld [vmem:[#allocation2 + $0x4d8] ss:$20 sps:$4 sm:$0xff]  }
  0x6a   :  { %1905 = vmatprep.subr.bf16.mxu1 %v3962_v11  ;;  %v4044_v10 = vld [vmem:[#allocation2 + $0x4b8] ss:$20 sps:$4 sm:$0xff]  }
  0x6b   :  { %v4051_v11 = vld [vmem:[#allocation2 + $0x504] ss:$20 sps:$4 sm:$0xff]  }
  0x6c   :  { %1897 = vmatmul.mubr.bf16.vlgmr.msra.gmra.mrb[4].mxu1 %v4524_v8  ;;  %1744 = vmatpush1.bf16.msra.mxu0 %v3957_v12  ;;  %v4054_v12 = vld [vmem:[#allocation2 + $0x4e4] ss:$20 sps:$4 sm:$0xff]  }
  0x6d   :  { %1906 = vmatpush1.bf16.msra.mxu1 %v3960_v13  ;;  %1745 = vmatprep.subr.bf16.mxu0 %v3965_v14  ;;  %v4541_v13 = vcombine.low %v4531_v32, %v4531_v32  ;;  %v4049_v14 = vld [vmem:[#allocation2 + $0x500] ss:$20 sps:$4 sm:$0xff]  }
  0x6e   :  { %1907 = vmatprep.subr.bf16.mxu1 %v3968_v15  ;;  %1937 = vmatprep.mubr.bf16.mxu1 %v4535_v35  ;;  %v4052_v15 = vld [vmem:[#allocation2 + $0x4e0] ss:$20 sps:$4 sm:$0xff]  }
  0x6f   :  { %v4073_v32 = vld [vmem:[#allocation2 + $0x5a0] ss:$20 sps:$4 sm:$0xff]  }
  0x70   :  { %1746 = vmatpush1.bf16.msra.mxu0 %v3963_v16  ;;  %v4057_v16 = vld [vmem:[#allocation2 + $0x52c] ss:$20 sps:$4 sm:$0xff]  }
  0x71   :  { %1908 = vmatpush1.bf16.msra.mxu1 %v3966_v17  ;;  %1747 = vmatprep.subr.bf16.mxu0 %v3971_v18  ;;  %v4060_v17 = vld [vmem:[#allocation2 + $0x50c] ss:$20 sps:$4 sm:$0xff]   ;;  %v4546_v18 = vld [vmem:[%s4743_s0 + $0x10] sm:$0xff] }
  0x72   :  { %1909 = vmatprep.subr.bf16.mxu1 %v3974_v19  ;;  %v4055_v19 = vld [vmem:[#allocation2 + $0x528] ss:$20 sps:$4 sm:$0xff]  }
  0x74   :  { %1748 = vmatpush1.bf16.msra.mxu0 %v3969_v20  ;;  %v4550_v20 = vcombine.high %v4546_v18, %v4546_v18 }
  0x75   :  { %1910 = vmatpush1.bf16.msra.mxu1 %v3972_v21  ;;  %1749 = vmatprep.subr.bf16.mxu0 %v3977_v22  ;;  %v4058_v21 = vld [vmem:[#allocation2 + $0x508] ss:$20 sps:$4 sm:$0xff]  }
  0x76   :  { %1911 = vmatprep.subr.bf16.mxu1 %v3980_v23  ;;  %v4063_v22 = vld [vmem:[#allocation2 + $0x554] ss:$20 sps:$4 sm:$0xff]  }
  0x77   :  { %v4066_v23 = vld [vmem:[#allocation2 + $0x534] ss:$20 sps:$4 sm:$0xff]  }
  0x78   :  { %1750 = vmatpush1.bf16.msra.mxu0 %v3975_v24  ;;  %v4061_v24 = vld [vmem:[#allocation2 + $0x550] ss:$20 sps:$4 sm:$0xff]  }
  0x79   :  { %1912 = vmatpush1.bf16.msra.mxu1 %v3978_v25  ;;  %1751 = vmatprep.subr.bf16.mxu0 %v3983_v26  ;;  %v4064_v25 = vld [vmem:[#allocation2 + $0x530] ss:$20 sps:$4 sm:$0xff]  }
  0x7a   :  { %1913 = vmatprep.subr.bf16.mxu1 %v3986_v27  ;;  %v4069_v26 = vld [vmem:[#allocation2 + $0x57c] ss:$20 sps:$4 sm:$0xff]  }
  0x7b   :  { %v4072_v27 = vld [vmem:[#allocation2 + $0x55c] ss:$20 sps:$4 sm:$0xff]  }
  0x7c   :  { %1752 = vmatpush1.bf16.msra.mxu0 %v3981_v28  ;;  %v4067_v28 = vld [vmem:[#allocation2 + $0x578] ss:$20 sps:$4 sm:$0xff]  }
  0x7d   :  { %1914 = vmatpush1.bf16.msra.mxu1 %v3984_v29  ;;  %1753 = vmatprep.subr.bf16.mxu0 %v3989_v30  ;;  %v4070_v29 = vld [vmem:[#allocation2 + $0x558] ss:$20 sps:$4 sm:$0xff]  }
  0x7e   :  { %1915 = vmatprep.subr.bf16.mxu1 %v3992_v31  ;;  %v4075_v30 = vld [vmem:[#allocation2 + $0x5a4] ss:$20 sps:$4 sm:$0xff]  }
  0x7f   :  { %v4078_v31 = vld [vmem:[#allocation2 + $0x584] ss:$20 sps:$4 sm:$0xff]  }
  0x80   :  { %1754 = vmatpush1.bf16.msra.mxu0 %v3987_v33  ;;  %v4076_v33 = vld [vmem:[#allocation2 + $0x580] ss:$20 sps:$4 sm:$0xff]  }
  0x81   :  { %1916 = vmatpush1.bf16.msra.mxu1 %v3990_v34  ;;  %1755 = vmatprep.subr.bf16.mxu0 %v3995_v36  ;;  %v4081_v34 = vld [vmem:[#allocation2 + $0x5cc] ss:$20 sps:$4 sm:$0xff]  }
  0x82   :  { %1917 = vmatprep.subr.bf16.mxu1 %v3998_v37  ;;  %v4084_v36 = vld [vmem:[#allocation2 + $0x5ac] ss:$20 sps:$4 sm:$0xff]   ;;  %v4079_v37 = vld [vmem:[#allocation2 + $0x5c8] ss:$20 sps:$4 sm:$0xff]  }
  0x84   :  { %1756 = vmatpush1.bf16.msra.mxu0 %v3993_v38  ;;  %v4082_v38 = vld [vmem:[#allocation2 + $0x5a8] ss:$20 sps:$4 sm:$0xff]  }
  0x85   :  { %1918 = vmatpush1.bf16.msra.mxu1 %v3996_v39  ;;  %1757 = vmatprep.subr.bf16.mxu0 %v4001_v40  ;;  %v4087_v39 = vld [vmem:[#allocation2 + $0x5f4] ss:$20 sps:$4 sm:$0xff]  }
  0x86   :  { %1919 = vmatprep.subr.bf16.mxu1 %v4004_v41  ;;  %v4090_v40 = vld [vmem:[#allocation2 + $0x5d4] ss:$20 sps:$4 sm:$0xff]   ;;  %v4085_v41 = vld [vmem:[#allocation2 + $0x5f0] ss:$20 sps:$4 sm:$0xff]  }
  0x88   :  { %1758 = vmatpush1.bf16.msra.mxu0 %v3999_v42  ;;  %v4088_v42 = vld [vmem:[#allocation2 + $0x5d0] ss:$20 sps:$4 sm:$0xff]  }
  0x89   :  { %1920 = vmatpush1.bf16.msra.mxu1 %v4002_v43  ;;  %1759 = vmatprep.subr.bf16.mxu0 %v4007_v44  ;;  %v4093_v43 = vld [vmem:[#allocation2 + $0x61c] ss:$20 sps:$4 sm:$0xff]  }
  0x8a   :  { %1921 = vmatprep.subr.bf16.mxu1 %v4010_v45  ;;  %v4096_v44 = vld [vmem:[#allocation2 + $0x5fc] ss:$20 sps:$4 sm:$0xff]   ;;  %v4091_v45 = vld [vmem:[#allocation2 + $0x618] ss:$20 sps:$4 sm:$0xff]  }
  0x8c   :  { %1760 = vmatpush1.bf16.msra.mxu0 %v4005_v46  ;;  %v4094_v46 = vld [vmem:[#allocation2 + $0x5f8] ss:$20 sps:$4 sm:$0xff]  }
  0x8d   :  { %1922 = vmatpush1.bf16.msra.mxu1 %v4008_v47  ;;  %1761 = vmatprep.subr.bf16.mxu0 %v4013_v48  ;;  %v4099_v47 = vld [vmem:[#allocation2 + $0x644] ss:$20 sps:$4 sm:$0xff]  }
  0x8e   :  { %1923 = vmatprep.subr.bf16.mxu1 %v4016_v49  ;;  %v4102_v48 = vld [vmem:[#allocation2 + $0x624] ss:$20 sps:$4 sm:$0xff]   ;;  %v4097_v49 = vld [vmem:[#allocation2 + $0x640] ss:$20 sps:$4 sm:$0xff]  }
  0x90   :  { %1762 = vmatpush1.bf16.msra.mxu0 %v4011_v50  ;;  %v4100_v50 = vld [vmem:[#allocation2 + $0x620] ss:$20 sps:$4 sm:$0xff]  }
  0x91   :  { %1924 = vmatpush1.bf16.msra.mxu1 %v4014_v51  ;;  %1763 = vmatprep.subr.bf16.mxu0 %v4019_v53  ;;  %v4105_v51 = vld [vmem:[#allocation2 + $0x66c] ss:$20 sps:$4 sm:$0xff]  }
  0x92   :  { %1925 = vmatprep.subr.bf16.mxu1 %v4022_v54  ;;  %v4108_v53 = vld [vmem:[#allocation2 + $0x64c] ss:$20 sps:$4 sm:$0xff]   ;;  %v4103_v54 = vld [vmem:[#allocation2 + $0x668] ss:$20 sps:$4 sm:$0xff]  }
  0x94   :  { %1764 = vmatpush1.bf16.msra.mxu0 %v4017_v55  ;;  %v4106_v55 = vld [vmem:[#allocation2 + $0x648] ss:$20 sps:$4 sm:$0xff]  }
  0x95   :  { %1926 = vmatpush1.bf16.msra.mxu1 %v4020_v56  ;;  %1765 = vmatprep.subr.bf16.mxu0 %v4025_v57  ;;  %v4111_v56 = vld [vmem:[#allocation2 + $0x694] ss:$20 sps:$4 sm:$0xff]  }
  0x96   :  { %1927 = vmatprep.subr.bf16.mxu1 %v4028_v58  ;;  %v4114_v57 = vld [vmem:[#allocation2 + $0x674] ss:$20 sps:$4 sm:$0xff]   ;;  %v4109_v58 = vld [vmem:[#allocation2 + $0x690] ss:$20 sps:$4 sm:$0xff]  }
  0x98   :  { %1766 = vmatpush1.bf16.msra.mxu0 %v4023_v59  ;;  %v4112_v59 = vld [vmem:[#allocation2 + $0x670] ss:$20 sps:$4 sm:$0xff]  }
  0x99   :  { %1928 = vmatpush1.bf16.msra.mxu1 %v4026_v60  ;;  %1767 = vmatprep.subr.bf16.mxu0 %v4031_v61  ;;  %v4117_v60 = vld [vmem:[#allocation2 + $0x6bc] ss:$20 sps:$4 sm:$0xff]  }
  0x9a   :  { %1929 = vmatprep.subr.bf16.mxu1 %v4034_v62  ;;  %v4120_v61 = vld [vmem:[#allocation2 + $0x69c] ss:$20 sps:$4 sm:$0xff]   ;;  %v4115_v62 = vld [vmem:[#allocation2 + $0x6b8] ss:$20 sps:$4 sm:$0xff]  }
  0x9c   :  { %1768 = vmatpush1.bf16.msra.mxu0 %v4029_v63  ;;  %v4118_v63 = vld [vmem:[#allocation2 + $0x698] ss:$20 sps:$4 sm:$0xff]  }
  0x9d   :  { %1930 = vmatpush1.bf16.msra.mxu1 %v4032_v1  ;;  %1769 = vmatprep.subr.bf16.mxu0 %v4037_v2  ;;  %v4123_v1 = vld [vmem:[#allocation2 + $0x6e4] ss:$20 sps:$4 sm:$0xff]  }
  0x9e   :  { %1931 = vmatprep.subr.bf16.mxu1 %v4040_v3  ;;  %v4126_v2 = vld [vmem:[#allocation2 + $0x6c4] ss:$20 sps:$4 sm:$0xff]   ;;  %v4121_v3 = vld [vmem:[#allocation2 + $0x6e0] ss:$20 sps:$4 sm:$0xff]  }
  0xa0   :  { %1770 = vmatpush1.bf16.msra.mxu0 %v4035_v4  ;;  %v4124_v4 = vld [vmem:[#allocation2 + $0x6c0] ss:$20 sps:$4 sm:$0xff]  }
  0xa1   :  { %1932 = vmatpush1.bf16.msra.mxu1 %v4038_v5  ;;  %1771 = vmatprep.subr.bf16.mxu0 %v4043_v6  ;;  %v4129_v5 = vld [vmem:[#allocation2 + $0x70c] ss:$20 sps:$4 sm:$0xff]  }
  0xa2   :  { %1933 = vmatprep.subr.bf16.mxu1 %v4046_v7  ;;  %v4132_v6 = vld [vmem:[#allocation2 + $0x6ec] ss:$20 sps:$4 sm:$0xff]   ;;  %v4127_v7 = vld [vmem:[#allocation2 + $0x708] ss:$20 sps:$4 sm:$0xff]  }
  0xa4   :  { %1772 = vmatpush1.bf16.msra.mxu0 %v4041_v9  ;;  %v4130_v9 = vld [vmem:[#allocation2 + $0x6e8] ss:$20 sps:$4 sm:$0xff]  }
  0xa5   :  { %1934 = vmatpush1.bf16.msra.mxu1 %v4044_v10  ;;  %1782 = vmatprep.subr.bf16.mxu0 %v4051_v11  ;;  %v4135_v10 = vld [vmem:[#allocation2 + $0x734] ss:$20 sps:$4 sm:$0xff]  }
  0xa6   :  { %1935 = vmatprep.subr.bf16.mxu1 %v4054_v12  ;;  %v4138_v11 = vld [vmem:[#allocation2 + $0x714] ss:$20 sps:$4 sm:$0xff]   ;;  %v4133_v12 = vld [vmem:[#allocation2 + $0x730] ss:$20 sps:$4 sm:$0xff]  }
  0xa7   :  { %1774 = vmatmul.mubr.bf16.vlgmr.msra.gmra.mrb[0].mxu0 %v4541_v13 }
  0xa8   :  { %1783 = vmatpush1.bf16.msra.mxu0 %v4049_v14  ;;  %1814 = vmatprep.mubr.bf16.mxu0 %v4550_v20  ;;  %v4136_v14 = vld [vmem:[#allocation2 + $0x710] ss:$20 sps:$4 sm:$0xff]  }
  0xa9   :  { %1936 = vmatpush1.bf16.msra.mxu1 %v4052_v15  ;;  %1784 = vmatprep.subr.bf16.mxu0 %v4057_v16  ;;  %v4141_v15 = vld [vmem:[#allocation2 + $0x75c] ss:$20 sps:$4 sm:$0xff]  }
  0xaa   :  { %1946 = vmatprep.subr.bf16.mxu1 %v4060_v17  ;;  %v4144_v16 = vld [vmem:[#allocation2 + $0x73c] ss:$20 sps:$4 sm:$0xff]   ;;  %v4139_v17 = vld [vmem:[#allocation2 + $0x758] ss:$20 sps:$4 sm:$0xff]  }
  0xac   :  { %1938 = vmatmul.mubr.bf16.vlgmr.msra.gmra.mrb[4].mxu1 %v4541_v13  ;;  %1785 = vmatpush1.bf16.msra.mxu0 %v4055_v19  ;;  %v4142_v19 = vld [vmem:[#allocation2 + $0x738] ss:$20 sps:$4 sm:$0xff]  }
  0xad   :  { %1947 = vmatpush1.bf16.msra.mxu1 %v4058_v21  ;;  %1786 = vmatprep.subr.bf16.mxu0 %v4063_v22  ;;  %v4149_v21 = vld [vmem:[#allocation2 + $0x764] ss:$20 sps:$4 sm:$0xff]  }
  0xae   :  { %1948 = vmatprep.subr.bf16.mxu1 %v4066_v23  ;;  %1978 = vmatprep.mubr.bf16.mxu1 %v4550_v20  ;;  %v4150_v22 = vld [vmem:[#allocation2 + $0x150] ss:$20 sps:$4 sm:$0xff]   ;;  %v4558_v23 = vcombine.low %v4546_v18, %v4546_v18  ;;  %v4155_v18 = vld [vmem:[#allocation2 + $0x60] ss:$20 sps:$4 sm:$0xff]  }
  0xb0   :  { %1787 = vmatpush1.bf16.msra.mxu0 %v4061_v24  ;;  %v4147_v24 = vld [vmem:[#allocation2 + $0x760] ss:$20 sps:$4 sm:$0xff]  }
  0xb1   :  { %1949 = vmatpush1.bf16.msra.mxu1 %v4064_v25  ;;  %1788 = vmatprep.subr.bf16.mxu0 %v4069_v26  ;;  %v4151_v25 = vld [vmem:[#allocation2 + $0x10] ss:$20 sps:$4 sm:$0xff]   ;;  %v4152_v26 = vld [vmem:[#allocation2 + $0x178] ss:$20 sps:$4 sm:$0xff]  }
  0xb2   :  { %1950 = vmatprep.subr.bf16.mxu1 %v4072_v27  ;;  %v4158_v27 = vld [vmem:[#allocation2 + $0x78c] ss:$20 sps:$4 sm:$0xff]  }
  0xb4   :  { %1789 = vmatpush1.bf16.msra.mxu0 %v4067_v28  ;;  %v4153_v28 = vld [vmem:[#allocation2 + $0x38] ss:$20 sps:$4 sm:$0xff]  }
  0xb5   :  { %1951 = vmatpush1.bf16.msra.mxu1 %v4070_v29  ;;  %1790 = vmatprep.subr.bf16.mxu0 %v4075_v30  ;;  %v4156_v29 = vld [vmem:[#allocation2 + $0x788] ss:$20 sps:$4 sm:$0xff]   ;;  %v4154_v30 = vld [vmem:[#allocation2 + $0x1a0] ss:$20 sps:$4 sm:$0xff]  }
  0xb6   :  { %1952 = vmatprep.subr.bf16.mxu1 %v4078_v31  ;;  %v4159_v31 = vld [vmem:[#allocation2 + $0x1c8] ss:$20 sps:$4 sm:$0xff]  }
  0xb8   :  { %1791 = vmatpush1.bf16.msra.mxu0 %v4073_v32  ;;  %v4160_v32 = vld [vmem:[#allocation2 + $0x88] ss:$20 sps:$4 sm:$0xff]  }
  0xb9   :  { %1953 = vmatpush1.bf16.msra.mxu1 %v4076_v33  ;;  %1792 = vmatprep.subr.bf16.mxu0 %v4081_v34  ;;  %v4416_v33 = vmov 0.0   ;;  %v4161_v34 = vld [vmem:[#allocation2 + $0x1f0] ss:$20 sps:$4 sm:$0xff]  }
  0xba   :  { %1954 = vmatprep.subr.bf16.mxu1 %v4084_v36  ;;  %v4162_v36 = vld [vmem:[#allocation2 + $0xb0] ss:$20 sps:$4 sm:$0xff]  }
  0xbc   :  { %1793 = vmatpush1.bf16.msra.mxu0 %v4079_v37  ;;  %v4201_v37 = vld [vmem:[#allocation2 + $0x790] ss:$20 sps:$4 sm:$0xff]  }
  0xbd   :  { %1955 = vmatpush1.bf16.msra.mxu1 %v4082_v38  ;;  %1794 = vmatprep.subr.bf16.mxu0 %v4087_v39  ;;  %v4163_v38 = vld [vmem:[#allocation2 + $0x218] ss:$20 sps:$4 sm:$0xff]  }
  0xbe   :  { %1956 = vmatprep.subr.bf16.mxu1 %v4090_v40  ;;  %v4164_v39 = vld [vmem:[#allocation2 + $0xd8] ss:$20 sps:$4 sm:$0xff]  }
  0xbf   :  { %v4360_v40 = vld [vmem:[%s4743_s0 + $0x18] ss:$0 sps:$4 sm:$0xff]  }
  0xc0   :  { %1795 = vmatpush1.bf16.msra.mxu0 %v4085_v41  ;;  %v4165_v41 = vld [vmem:[#allocation2 + $0x240] ss:$20 sps:$4 sm:$0xff]  }
  0xc1   :  { %1957 = vmatpush1.bf16.msra.mxu1 %v4088_v42  ;;  %1796 = vmatprep.subr.bf16.mxu0 %v4093_v43  ;;  %v4166_v42 = vld [vmem:[#allocation2 + $0x100] ss:$20 sps:$4 sm:$0xff]   ;;  %v4202_v43 = vld [vmem:[#allocation4] ss:$8 sps:$4 sm:$0xff]  }
  0xc2   :  { %1958 = vmatprep.subr.bf16.mxu1 %v4096_v44  ;;  %v4167_v44 = vld [vmem:[#allocation2 + $0x268] ss:$20 sps:$4 sm:$0xff]  }
  0xc4   :  { %1797 = vmatpush1.bf16.msra.mxu0 %v4091_v45  ;;  %v4207_v45 = vld [vmem:[#allocation4 + $0x14] ss:$8 sps:$4 sm:$0xff]  }
  0xc5   :  { %1959 = vmatpush1.bf16.msra.mxu1 %v4094_v46  ;;  %1798 = vmatprep.subr.bf16.mxu0 %v4099_v47  ;;  %v4168_v46 = vld [vmem:[#allocation2 + $0x128] ss:$20 sps:$4 sm:$0xff]  }
  0xc6   :  { %1960 = vmatprep.subr.bf16.mxu1 %v4102_v48  ;;  %v4205_v48 = vld [vmem:[#allocation4 + $0x10] ss:$8 sps:$4 sm:$0xff]  }
  0xc8   :  { %1799 = vmatpush1.bf16.msra.mxu0 %v4097_v49  ;;  %v4169_v49 = vld [vmem:[#allocation2 + $0x3d0] ss:$20 sps:$4 sm:$0xff]  }
  0xc9   :  { %1961 = vmatpush1.bf16.msra.mxu1 %v4100_v50  ;;  %1800 = vmatprep.subr.bf16.mxu0 %v4105_v51  ;;  %v4210_v51 = vld [vmem:[#allocation4 + $0x24] ss:$8 sps:$4 sm:$0xff]  }
  0xca   :  { %1962 = vmatprep.subr.bf16.mxu1 %v4108_v53 }
  0xcc   :  { %1801 = vmatpush1.bf16.msra.mxu0 %v4103_v54 }
  0xcd   :  { %1963 = vmatpush1.bf16.msra.mxu1 %v4106_v55  ;;  %1802 = vmatprep.subr.bf16.mxu0 %v4111_v56  ;;  %v4170_v55 = vld [vmem:[#allocation2 + $0x290] ss:$20 sps:$4 sm:$0xff]   ;;  %v4171_v56 = vld [vmem:[#allocation2 + $0x3f8] ss:$20 sps:$4 sm:$0xff]  }
  0xce   :  { %1964 = vmatprep.subr.bf16.mxu1 %v4114_v57  ;;  %v4208_v57 = vld [vmem:[#allocation4 + $0x20] ss:$8 sps:$4 sm:$0xff]  }
  0xd0   :  { %1803 = vmatpush1.bf16.msra.mxu0 %v4109_v58  ;;  %v4213_v58 = vld [vmem:[#allocation4 + $0x34] ss:$8 sps:$4 sm:$0xff]  }
  0xd1   :  { %1965 = vmatpush1.bf16.msra.mxu1 %v4112_v59  ;;  %1804 = vmatprep.subr.bf16.mxu0 %v4117_v60  ;;  %v4172_v59 = vld [vmem:[#allocation2 + $0x2b8] ss:$20 sps:$4 sm:$0xff]   ;;  %v4173_v60 = vld [vmem:[#allocation2 + $0x420] ss:$20 sps:$4 sm:$0xff]  }
  0xd2   :  { %1966 = vmatprep.subr.bf16.mxu1 %v4120_v61  ;;  %v4211_v61 = vld [vmem:[#allocation4 + $0x30] ss:$8 sps:$4 sm:$0xff]  }
  0xd4   :  { %1805 = vmatpush1.bf16.msra.mxu0 %v4115_v62  ;;  %v4216_v62 = vld [vmem:[#allocation4 + $0x44] ss:$8 sps:$4 sm:$0xff]  }
  0xd5   :  { %1967 = vmatpush1.bf16.msra.mxu1 %v4118_v63  ;;  %1806 = vmatprep.subr.bf16.mxu0 %v4123_v1  ;;  %v4174_v63 = vld [vmem:[#allocation2 + $0x2e0] ss:$20 sps:$4 sm:$0xff]   ;;  %v4175_v1 = vld [vmem:[#allocation2 + $0x448] ss:$20 sps:$4 sm:$0xff]  }
  0xd6   :  { %1968 = vmatprep.subr.bf16.mxu1 %v4126_v2  ;;  %v4214_v2 = vld [vmem:[#allocation4 + $0x40] ss:$8 sps:$4 sm:$0xff]  }
  0xd8   :  { %1807 = vmatpush1.bf16.msra.mxu0 %v4121_v3  ;;  %v4219_v3 = vld [vmem:[#allocation4 + $0x54] ss:$8 sps:$4 sm:$0xff]  }
  0xd9   :  { %1969 = vmatpush1.bf16.msra.mxu1 %v4124_v4  ;;  %1808 = vmatprep.subr.bf16.mxu0 %v4129_v5  ;;  %v4176_v4 = vld [vmem:[#allocation2 + $0x308] ss:$20 sps:$4 sm:$0xff]   ;;  %v4177_v5 = vld [vmem:[#allocation2 + $0x470] ss:$20 sps:$4 sm:$0xff]  }
  0xda   :  { %1970 = vmatprep.subr.bf16.mxu1 %v4132_v6  ;;  %v4222_v6 = vld [vmem:[#allocation4 + $0x64] ss:$8 sps:$4 sm:$0xff]  }
  0xdc   :  { %1809 = vmatpush1.bf16.msra.mxu0 %v4127_v7  ;;  %v4179_v7 = vld [vmem:[#allocation2 + $0x498] ss:$20 sps:$4 sm:$0xff]  }
  0xdd   :  { %1971 = vmatpush1.bf16.msra.mxu1 %v4130_v9  ;;  %1810 = vmatprep.subr.bf16.mxu0 %v4135_v10  ;;  %v4220_v9 = vld [vmem:[#allocation4 + $0x60] ss:$8 sps:$4 sm:$0xff]   ;;  %v4225_v10 = vld [vmem:[#allocation4 + $0x74] ss:$8 sps:$4 sm:$0xff]  }
  0xde   :  { %1972 = vmatprep.subr.bf16.mxu1 %v4138_v11  ;;  %v4180_v11 = vld [vmem:[#allocation2 + $0x358] ss:$20 sps:$4 sm:$0xff]  }
  0xe0   :  { %1811 = vmatpush1.bf16.msra.mxu0 %v4133_v12  ;;  %v4181_v12 = vld [vmem:[#allocation2 + $0x4c0] ss:$20 sps:$4 sm:$0xff]  }
  0xe1   :  { %1973 = vmatpush1.bf16.msra.mxu1 %v4136_v14  ;;  %1812 = vmatprep.subr.bf16.mxu0 %v4141_v15  ;;  %v4223_v14 = vld [vmem:[#allocation4 + $0x70] ss:$8 sps:$4 sm:$0xff]   ;;  %v4228_v15 = vld [vmem:[#allocation4 + $0x84] ss:$8 sps:$4 sm:$0xff]  }
  0xe2   :  { %1974 = vmatprep.subr.bf16.mxu1 %v4144_v16  ;;  %v4182_v16 = vld [vmem:[#allocation2 + $0x380] ss:$20 sps:$4 sm:$0xff]  }
  0xe4   :  { %1813 = vmatpush1.bf16.msra.mxu0 %v4139_v17  ;;  %v4183_v17 = vld [vmem:[#allocation2 + $0x4e8] ss:$20 sps:$4 sm:$0xff]  }
  0xe5   :  { %1975 = vmatpush1.bf16.msra.mxu1 %v4142_v19  ;;  %3654 = vmatprep.subr.bf16.mxu0 %v4150_v22  ;;  %v4226_v19 = vld [vmem:[#allocation4 + $0x80] ss:$8 sps:$4 sm:$0xff]  }
  0xe6   :  { %1976 = vmatprep.subr.bf16.mxu1 %v4149_v21  ;;  %v4231_v21 = vld [vmem:[#allocation4 + $0x94] ss:$8 sps:$4 sm:$0xff]  }
  0xe7   :  { %1815 = vmatmul.mubr.bf16.vlgmr.msra.gmra.mrb[0].mxu0 %v4558_v23  ;;  %v4184_v22 = vld [vmem:[#allocation2 + $0x3a8] ss:$20 sps:$4 sm:$0xff]  }
  0xe8   :  { %3655 = vmatpush3.bf16.msra.mxu0 %v4151_v25  ;;  %2060 = vmatprep.mubr.bf16.mxu0 %v4520_v52  ;;  %v4204_v52 = vld [vmem:[#allocation4 + $0x4] ss:$8 sps:$4 sm:$0xff]   ;;  %v4229_v25 = vld [vmem:[#allocation4 + $0x90] ss:$8 sps:$4 sm:$0xff]  }
  0xe9   :  { %1977 = vmatpush1.bf16.msra.mxu1 %v4147_v24  ;;  %3656 = vmatprep.subr.bf16.mxu0 %v4152_v26  ;;  %v4185_v24 = vld [vmem:[#allocation2 + $0x650] ss:$20 sps:$4 sm:$0xff]   ;;  %v4234_v26 = vld [vmem:[#allocation4 + $0xa4] ss:$8 sps:$4 sm:$0xff]  }
  0xea   :  { %1987 = vmatprep.subr.bf16.mxu1 %v4158_v27  ;;  %v4186_v27 = vld [vmem:[#allocation2 + $0x510] ss:$20 sps:$4 sm:$0xff]  }
  0xec   :  { %1979 = vmatmul.mubr.bf16.vlgmr.msra.gmra.mrb[4].mxu1 %v4558_v23  ;;  %3657 = vmatpush3.bf16.msra.mxu0 %v4153_v28  ;;  %v4187_v28 = vld [vmem:[#allocation2 + $0x678] ss:$20 sps:$4 sm:$0xff]  }
  0xed   :  { %1988 = vmatpush1.bf16.msra.mxu1 %v4156_v29  ;;  %3658 = vmatprep.subr.bf16.mxu0 %v4154_v30  ;;  %v4232_v29 = vld [vmem:[#allocation4 + $0xa0] ss:$8 sps:$4 sm:$0xff]   ;;  %v4237_v30 = vld [vmem:[#allocation4 + $0xb4] ss:$8 sps:$4 sm:$0xff]  }
  0xee   :  { %2019 = vmatprep.mubr.bf16.mxu1 %v4415_v0  ;;  %3761 = vmatprep.subr.bf16.mxu1 %v4416_v33 }
  0xf0   :  { %3659 = vmatpush3.bf16.msra.mxu0 %v4155_v18  ;;  %v4188_v18 = vld [vmem:[#allocation2 + $0x538] ss:$20 sps:$4 sm:$0xff]  }
  0xf1   :  { %3660 = vmatprep.subr.bf16.mxu0 %v4159_v31  ;;  %v4189_v31 = vld [vmem:[#allocation2 + $0x6a0] ss:$20 sps:$4 sm:$0xff]  }
  0xf4   :  { %3661 = vmatpush3.bf16.msra.mxu0 %v4160_v32  ;;  %v4235_v32 = vld [vmem:[#allocation4 + $0xb0] ss:$8 sps:$4 sm:$0xff]  }
  0xf5   :  { %3662 = vmatprep.subr.bf16.mxu0 %v4161_v34  ;;  %v4240_v34 = vld [vmem:[#allocation4 + $0xc4] ss:$8 sps:$4 sm:$0xff]  }
  0xf8   :  { %3536 = vmatmul.mubr.msk.bf16.vlgmr.msra.gmra.mrb[4].mxu1 %vm1696_vm0, %v4360_v40  ;;  %3663 = vmatpush3.bf16.msra.mxu0 %v4162_v36  ;;  %v4190_v36 = vld [vmem:[#allocation2 + $0x560] ss:$20 sps:$4 sm:$0xff]  }
  0xf9   :  { %3762 = vmatpush3.bf16.msra.mxu1 %v4201_v37  ;;  %3664 = vmatprep.subr.bf16.mxu0 %v4163_v38  ;;  %v4191_v37 = vld [vmem:[#allocation2 + $0x6c8] ss:$20 sps:$4 sm:$0xff]  }
  0xfa   :  { %3763 = vmatprep.mubr.msk.bf16.mxu1 %vm4417_vm1, %v4416_v33  ;;  %2690 = vmatprep.subr.bf16.mxu1 %v4204_v52  ;;  %v4238_v38 = vld [vmem:[#allocation4 + $0xc0] ss:$8 sps:$4 sm:$0xff]   ;;  %v4243_v52 = vld [vmem:[#allocation4 + $0xd4] ss:$8 sps:$4 sm:$0xff]  }
  0xfc   :  { %3665 = vmatpush3.bf16.msra.mxu0 %v4164_v39  ;;  %v4193_v39 = vld [vmem:[#allocation2 + $0x6f0] ss:$20 sps:$4 sm:$0xff]  }
  0xfd   :  { %3666 = vmatprep.subr.bf16.mxu0 %v4165_v41  ;;  %v4195_v41 = vld [vmem:[#allocation2 + $0x718] ss:$20 sps:$4 sm:$0xff]  }
  0xff   :  { %v4571_v47 = vpop.f32.mrb[0].mxu1 }
 0x100   :  { %v4573_v50 = vpop.f32.mrb[1].mxu1  ;;  %3764 = vmatmul.mubr.msk.bf16.vlgmr.msra.gmra.mrb[8].mxu1 %vm1696_vm0, %v4360_v40  ;;  %3667 = vmatpush3.bf16.msra.mxu0 %v4166_v42  ;;  %v4194_v40 = vld [vmem:[#allocation2 + $0x5b0] ss:$20 sps:$4 sm:$0xff]   ;;  %v4196_v42 = vld [vmem:[#allocation2 + $0x5d8] ss:$20 sps:$4 sm:$0xff]  }
 0x101   :  { %v1861_v53 = vpop.f32.mrb[2].mxu1  ;;  %2691 = vmatpush1.bf16.msra.mxu1 %v4202_v43  ;;  %3668 = vmatprep.subr.bf16.mxu0 %v4167_v44  ;;  %v4197_v43 = vld [vmem:[#allocation2 + $0x740] ss:$20 sps:$4 sm:$0xff]  }
 0x102   :  { %v1862_v54 = vpop.f32.mrb[3].mxu1  ;;  %2692 = vmatprep.subr.bf16.mxu1 %v4207_v45  ;;  %v4246_v44 = vld [vmem:[#allocation4 + $0xe4] ss:$8 sps:$4 sm:$0xff]   ;;  %v4244_v45 = vld [vmem:[#allocation4 + $0xe0] ss:$8 sps:$4 sm:$0xff]  }
 0x103   :  { %v4200_v53 = vld [vmem:[#allocation2 + $0x628] ss:$20 sps:$4 sm:$0xff]   ;;  %v4252_v54 = vld [vmem:[#allocation4 + $0x104] ss:$8 sps:$4 sm:$0xff]  }
 0x104   :  { %3669 = vmatpush3.bf16.msra.mxu0 %v4168_v46  ;;  %v4198_v46 = vld [vmem:[#allocation2 + $0x600] ss:$20 sps:$4 sm:$0xff]  }
 0x105   :  { %2693 = vmatpush1.bf16.msra.mxu1 %v4205_v48  ;;  %3676 = vmatprep.subr.bf16.mxu0 %v4169_v49  ;;  %v4199_v48 = vld [vmem:[#allocation2 + $0x768] ss:$20 sps:$4 sm:$0xff]  }
 0x106   :  { %2694 = vmatprep.subr.bf16.mxu1 %v4210_v51  ;;  %v4249_v49 = vld [vmem:[#allocation4 + $0xf4] ss:$8 sps:$4 sm:$0xff]   ;;  %v4247_v51 = vld [vmem:[#allocation4 + $0xf0] ss:$8 sps:$4 sm:$0xff]  }
 0x107   :  { %2061 = vmatmul.mubr.bf16.vlgmr.msra.gmra.mrb[4].mxu0 %v4524_v8  ;;  %v4217_v8 = vld [vmem:[#allocation4 + $0x50] ss:$8 sps:$4 sm:$0xff]  }
 0x108   :  { %3677 = vmatpush3.bf16.msra.mxu0 %v4170_v55  ;;  %2100 = vmatprep.mubr.bf16.mxu0 %v4535_v35  ;;  %v4178_v35 = vld [vmem:[#allocation2 + $0x330] ss:$20 sps:$4 sm:$0xff]  }
 0x109   :  { %3678 = vmatprep.subr.bf16.mxu0 %v4171_v56  ;;  %2695 = vmatpush1.bf16.msra.mxu1 %v4208_v57  ;;  %v4322_v55 = vld [vmem:[%s4748_s5 + $0x40] sm:$0xff]   ;;  %v4324_v57 = vld [vmem:[%s4748_s5 + $0x48] sm:$0xff]  }
 0x10a   :  { %2696 = vmatprep.subr.bf16.mxu1 %v4213_v58  ;;  %v4323_v56 = vld [vmem:[%s4748_s5] sm:$0xff]   ;;  %v4325_v58 = vld [vmem:[%s4748_s5 + $0x8] sm:$0xff]  }
 0x10c   :  { %3679 = vmatpush3.bf16.msra.mxu0 %v4172_v59  ;;  %v373_v59 = vlaneseq }
 0x10d   :  { %3680 = vmatprep.subr.bf16.mxu0 %v4173_v60  ;;  %2697 = vmatpush1.bf16.msra.mxu1 %v4211_v61  ;;  %v4327_v60 = vld [vmem:[%s4748_s5 + $0x10] sm:$0xff]   ;;  %v4328_v61 = vld [vmem:[%s4748_s5 + $0x58] sm:$0xff]  }
 0x10e   :  { %2698 = vmatprep.subr.bf16.mxu1 %v4216_v62  ;;  %v4602_v62 = vshrl.u32 %v373_v59, 7  ;;  %v4277_v59 = vld [vmem:[#allocation4 + $0x190] ss:$8 sps:$4 sm:$0xff]  }
 0x110   :  { %3681 = vmatpush3.bf16.msra.mxu0 %v4174_v63  ;;  %v4329_v63 = vld [vmem:[%s4748_s5 + $0x18] sm:$0xff]  }
 0x111   :  { %3682 = vmatprep.subr.bf16.mxu0 %v4175_v1  ;;  %2699 = vmatpush1.bf16.msra.mxu1 %v4214_v2  ;;  %v4330_v1 = vld [vmem:[%s4748_s5 + $0x60] sm:$0xff]   ;;  %v375_v2 = vsub.s32 0, %v4602_v62 }
 0x112   :  { %2700 = vmatprep.subr.bf16.mxu1 %v4219_v3  ;;  %v4614_v3 = vld [vmem:[%s4745_s2] sm:$0x1f] }
 0x114   :  { %3683 = vmatpush3.bf16.msra.mxu0 %v4176_v4  ;;  %v379_v4 = vsub.s32 1, %v4602_v62 }
 0x115   :  { %3684 = vmatprep.subr.bf16.mxu0 %v4177_v5  ;;  %2701 = vmatpush1.bf16.msra.mxu1 %v4217_v8  ;;  %v4331_v5 = vld [vmem:[%s4748_s5 + $0x20] sm:$0xff]   ;;  %v4332_v8 = vld [vmem:[%s4748_s5 + $0x68] sm:$0xff]  }
 0x116   :  { %2702 = vmatprep.subr.bf16.mxu1 %v4222_v6  ;;  %v376_v6 = vrot.slane %v4614_v3, %v375_v2 }
 0x118   :  { %3685 = vmatpush3.bf16.msra.mxu0 %v4178_v35  ;;  %v380_v35 = vrot.slane %v4614_v3, %v379_v4 }
 0x119   :  { %3686 = vmatprep.subr.bf16.mxu0 %v4179_v7  ;;  %2703 = vmatpush1.bf16.msra.mxu1 %v4220_v9  ;;  %v4333_v7 = vld [vmem:[%s4748_s5 + $0x28] sm:$0xff]  }
 0x11a   :  { %2704 = vmatprep.subr.bf16.mxu1 %v4225_v10 }
 0x11c   :  { %3687 = vmatpush3.bf16.msra.mxu0 %v4180_v11 }
 0x11d   :  { %3688 = vmatprep.subr.bf16.mxu0 %v4181_v12  ;;  %2705 = vmatpush1.bf16.msra.mxu1 %v4223_v14 }
 0x11e   :  { %2706 = vmatprep.subr.bf16.mxu1 %v4228_v15 }
 0x120   :  { %3689 = vmatpush3.bf16.msra.mxu0 %v4182_v16 }
 0x121   :  { %3690 = vmatprep.subr.bf16.mxu0 %v4183_v17  ;;  %2707 = vmatpush1.bf16.msra.mxu1 %v4226_v19 }
 0x122   :  { %2708 = vmatprep.subr.bf16.mxu1 %v4231_v21 }
 0x124   :  { %3691 = vmatpush3.bf16.msra.mxu0 %v4184_v22 }
 0x125   :  { %3698 = vmatprep.subr.bf16.mxu0 %v4185_v24  ;;  %2709 = vmatpush1.bf16.msra.mxu1 %v4229_v25  ;;  %v4250_v24 = vld [vmem:[#allocation4 + $0x100] ss:$8 sps:$4 sm:$0xff]  }
 0x126   :  { %2710 = vmatprep.subr.bf16.mxu1 %v4234_v26  ;;  %v4255_v26 = vld [vmem:[#allocation4 + $0x114] ss:$8 sps:$4 sm:$0xff]  }
 0x127   :  { %2101 = vmatmul.mubr.bf16.vlgmr.msra.gmra.mrb[8].mxu0 %v4541_v13  ;;  %v4192_v13 = vld [vmem:[#allocation2 + $0x588] ss:$20 sps:$4 sm:$0xff]  }
 0x128   :  { %3699 = vmatpush3.bf16.msra.mxu0 %v4186_v27  ;;  %2140 = vmatprep.mubr.bf16.mxu0 %v4550_v20  ;;  %v4241_v20 = vld [vmem:[#allocation4 + $0xd0] ss:$8 sps:$4 sm:$0xff]   ;;  %v387_v27 = vsub.s32 3, %v4602_v62 }
 0x129   :  { %3700 = vmatprep.subr.bf16.mxu0 %v4187_v28  ;;  %2711 = vmatpush1.bf16.msra.mxu1 %v4232_v29  ;;  %v4253_v28 = vld [vmem:[#allocation4 + $0x110] ss:$8 sps:$4 sm:$0xff]   ;;  %v4258_v29 = vld [vmem:[#allocation4 + $0x124] ss:$8 sps:$4 sm:$0xff]  }
 0x12a   :  { %2712 = vmatprep.subr.bf16.mxu1 %v4237_v30 }
 0x12c   :  { %3701 = vmatpush3.bf16.msra.mxu0 %v4188_v18 }
 0x12d   :  { %3702 = vmatprep.subr.bf16.mxu0 %v4189_v31  ;;  %2713 = vmatpush1.bf16.msra.mxu1 %v4235_v32  ;;  %v4261_v31 = vld [vmem:[#allocation4 + $0x134] ss:$8 sps:$4 sm:$0xff]  }
 0x12e   :  { %2714 = vmatprep.subr.bf16.mxu1 %v4240_v34 }
 0x130   :  { %3703 = vmatpush3.bf16.msra.mxu0 %v4190_v36 }
 0x131   :  { %3704 = vmatprep.subr.bf16.mxu0 %v4191_v37  ;;  %2715 = vmatpush1.bf16.msra.mxu1 %v4238_v38  ;;  %v4259_v38 = vld [vmem:[#allocation4 + $0x130] ss:$8 sps:$4 sm:$0xff]  }
 0x132   :  { %2716 = vmatprep.subr.bf16.mxu1 %v4243_v52  ;;  %v4264_v52 = vld [vmem:[#allocation4 + $0x144] ss:$8 sps:$4 sm:$0xff]  }
 0x134   :  { %3705 = vmatpush3.bf16.msra.mxu0 %v4192_v13 }
 0x135   :  { %3706 = vmatprep.subr.bf16.mxu0 %v4193_v39  ;;  %2717 = vmatpush1.bf16.msra.mxu1 %v4241_v20  ;;  %v4262_v39 = vld [vmem:[#allocation4 + $0x140] ss:$8 sps:$4 sm:$0xff]  }
 0x136   :  { %2718 = vmatprep.subr.bf16.mxu1 %v4246_v44  ;;  %v4265_v44 = vld [vmem:[#allocation4 + $0x150] ss:$8 sps:$4 sm:$0xff]  }
 0x138   :  { %3707 = vmatpush3.bf16.msra.mxu0 %v4194_v40  ;;  %v4267_v40 = vld [vmem:[#allocation4 + $0x154] ss:$8 sps:$4 sm:$0xff]  }
 0x139   :  { %3708 = vmatprep.subr.bf16.mxu0 %v4195_v41  ;;  %2719 = vmatpush1.bf16.msra.mxu1 %v4244_v45  ;;  %v4270_v45 = vld [vmem:[#allocation4 + $0x164] ss:$8 sps:$4 sm:$0xff]  }
 0x13a   :  { %2720 = vmatprep.subr.bf16.mxu1 %v4249_v49 }
 0x13c   :  { %3709 = vmatpush3.bf16.msra.mxu0 %v4196_v42 }
 0x13d   :  { %3710 = vmatprep.subr.bf16.mxu0 %v4197_v43  ;;  %2721 = vmatpush1.bf16.msra.mxu1 %v4247_v51  ;;  %v4273_v51 = vld [vmem:[#allocation4 + $0x174] ss:$8 sps:$4 sm:$0xff]  }
 0x13e   :  { %2731 = vmatprep.subr.bf16.mxu1 %v4252_v54 }
 0x140   :  { %3711 = vmatpush3.bf16.msra.mxu0 %v4198_v46 }
 0x141   :  { %3712 = vmatprep.subr.bf16.mxu0 %v4199_v48  ;;  %v4268_v48 = vld [vmem:[#allocation4 + $0x160] ss:$8 sps:$4 sm:$0xff]  }
 0x144   :  { %3713 = vmatpush3.bf16.msra.mxu0 %v4200_v53 }
 0x145   :  { %3722 = vmatprep.subr.bf16.mxu0 %v4322_v55 }
 0x147   :  { %2141 = vmatmul.mubr.bf16.vlgmr.msra.gmra.mrb[12].mxu0 %v4558_v23  ;;  %v4326_v23 = vld [vmem:[%s4748_s5 + $0x50] sm:$0xff]  }
 0x148   :  { %3723 = vmatpush3.bf16.msra.mxu0 %v4323_v56  ;;  %v4271_v56 = vld [vmem:[#allocation4 + $0x170] ss:$8 sps:$4 sm:$0xff]  }
 0x149   :  { %3724 = vmatprep.subr.bf16.mxu0 %v4324_v57  ;;  %v4276_v57 = vld [vmem:[#allocation4 + $0x184] ss:$8 sps:$4 sm:$0xff]  }
 0x14c   :  { %3725 = vmatpush3.bf16.msra.mxu0 %v4325_v58  ;;  %v4274_v58 = vld [vmem:[#allocation4 + $0x180] ss:$8 sps:$4 sm:$0xff]  }
 0x14d   :  { %3726 = vmatprep.subr.bf16.mxu0 %v4326_v23  ;;  %v4279_v23 = vld [vmem:[#allocation4 + $0x194] ss:$8 sps:$4 sm:$0xff]  }
 0x150   :  { %3727 = vmatpush3.bf16.msra.mxu0 %v4327_v60  ;;  %v4282_v60 = vld [vmem:[#allocation4 + $0x1a4] ss:$8 sps:$4 sm:$0xff]  }
 0x151   :  { %3728 = vmatprep.subr.bf16.mxu0 %v4328_v61  ;;  %v4280_v61 = vld [vmem:[#allocation4 + $0x1a0] ss:$8 sps:$4 sm:$0xff]  }
 0x154   :  { %3729 = vmatpush3.bf16.msra.mxu0 %v4329_v63  ;;  %v4285_v63 = vld [vmem:[#allocation4 + $0x1b4] ss:$8 sps:$4 sm:$0xff]  }
 0x155   :  { %3730 = vmatprep.subr.bf16.mxu0 %v4330_v1  ;;  %v4283_v1 = vld [vmem:[#allocation4 + $0x1b0] ss:$8 sps:$4 sm:$0xff]  }
 0x158   :  { %3731 = vmatpush3.bf16.msra.mxu0 %v4331_v5  ;;  %v4288_v5 = vld [vmem:[#allocation4 + $0x1c4] ss:$8 sps:$4 sm:$0xff]  }
 0x159   :  { %3732 = vmatprep.subr.bf16.mxu0 %v4332_v8  ;;  %v4286_v8 = vld [vmem:[#allocation4 + $0x1c0] ss:$8 sps:$4 sm:$0xff]  }
 0x15c   :  { %3733 = vmatpush3.bf16.msra.mxu0 %v4333_v7  ;;  %v391_v7 = vsub.s32 4, %v4602_v62 }
 0x1ba   :  { %v1816_v9 = vpop.f32.mrb[0].mxu0 }
 0x1bb   :  { %v3807_v10 = vadd.f32 %v1816_v9, %v376_v6  ;;  %v1818_v11 = vpop.f32.mrb[1].mxu0  ;;  %v383_v6 = vsub.s32 2, %v4602_v62  ;;  %v4289_v9 = vld [vmem:[#allocation4 + $0x1d0] ss:$8 sps:$4 sm:$0xff]   ;;  %v4339_v62 = vld [vmem:[%s4750_s7 + $0x8] sm:$0xff]  }
 0x1bc   :  { %v3809_v12 = vadd.f32 %v1818_v11, %v380_v35  ;;  %v1820_v14 = vpop.f32.mrb[2].mxu0  ;;  %v4291_v35 = vld [vmem:[#allocation4 + $0x1d4] ss:$8 sps:$4 sm:$0xff]   ;;  %v4294_v11 = vld [vmem:[#allocation4 + $0x1e4] ss:$8 sps:$4 sm:$0xff]  }
 0x1bd   :  { %v3808_v15 = vadd.f32 %v3807_v10, %v4571_v47  ;;  %v1821_v16 = vpop.f32.mrb[3].mxu0  ;;  %v388_v47 = vrot.slane %v4614_v3, %v387_v27  ;;  %v384_v10 = vrot.slane %v4614_v3, %v383_v6  ;;  %v4295_v27 = vld [vmem:[#allocation4 + $0x1f0] ss:$8 sps:$4 sm:$0xff]  }
 0x1be   :  { %v3810_v17 = vadd.f32 %v3809_v12, %v4573_v50  ;;  %v4256_v50 = vld [vmem:[#allocation4 + $0x120] ss:$8 sps:$4 sm:$0xff]   ;;  %v392_v12 = vrot.slane %v4614_v3, %v391_v7 }
 0x1bf   :  { %v2188_v19 = vmax.f32 %v3808_v15, 0.0  ;;  %v4292_v15 = vld [vmem:[#allocation4 + $0x1e0] ss:$8 sps:$4 sm:$0xff]  }
 0x1c0   :  { %v2189_v21 = vmax.f32 %v3810_v17, 0.0  ;;  %v4298_v3 = vld [vmem:[#allocation4 + $0x200] ss:$8 sps:$4 sm:$0xff]  }
 0x1c1   :  { %v2193_v25 = vpack.c.bf16 %v2188_v19, %v2188_v19  ;;  %v4297_v19 = vld [vmem:[#allocation4 + $0x1f4] ss:$8 sps:$4 sm:$0xff]  }
 0x1c2   :  { %v2194_v22 = vpack.c.bf16 %v2189_v21, %v2189_v21 }
 0x1c4   :  { %2722 = vmatprep.mubr.bf16.mxu1 %v2194_v22 }
 0x1c5   :  { %2723 = vmatmul.mubr.bf16.vlgmr.msra.gmra.mrb[12].mxu1 %v2193_v25 }
 0x1c6   :  { %2732 = vmatpush1.bf16.msra.mxu1 %v4250_v24 }
 0x1c7   :  { %2733 = vmatprep.subr.bf16.mxu1 %v4255_v26 }
 0x1ca   :  { %2734 = vmatpush1.bf16.msra.mxu1 %v4253_v28 }
 0x1cb   :  { %v4636_v30 = vpop.f32.mrb[4].mxu1  ;;  %2735 = vmatprep.subr.bf16.mxu1 %v4258_v29  ;;  %v4300_v29 = vld [vmem:[#allocation4 + $0x204] ss:$8 sps:$4 sm:$0xff]  }
 0x1cc   :  { %v2023_v18 = vpop.f32.mrb[5].mxu1  ;;  %v3811_v16 = vadd.f32 %v4636_v30, %v384_v10  ;;  %v4301_v30 = vld [vmem:[#allocation4 + $0x210] ss:$8 sps:$4 sm:$0xff]   ;;  %v4343_v10 = vld [vmem:[%s4750_s7 + $0x28] sm:$0xff]  }
 0x1cd   :  { %v3812_v32 = vadd.f32 %v2023_v18, %v388_v47  ;;  %v2025_v34 = vpop.f32.mrb[6].mxu1  ;;  %v4306_v18 = vld [vmem:[#allocation4 + $0x224] ss:$8 sps:$4 sm:$0xff]  }
 0x1ce   :  { %v2026_v36 = vpop.f32.mrb[7].mxu1  ;;  %2736 = vmatpush1.bf16.msra.mxu1 %v4256_v50  ;;  %v2190_v28 = vmax.f32 %v3811_v16, 0.0  ;;  %v4303_v50 = vld [vmem:[#allocation4 + $0x214] ss:$8 sps:$4 sm:$0xff]   ;;  %v4307_v34 = vld [vmem:[#allocation4 + $0x230] ss:$8 sps:$4 sm:$0xff]  }
 0x1cf   :  { %v2191_v37 = vmax.f32 %v3812_v32, 0.0  ;;  %2737 = vmatprep.subr.bf16.mxu1 %v4261_v31  ;;  %v4304_v31 = vld [vmem:[#allocation4 + $0x220] ss:$8 sps:$4 sm:$0xff]   ;;  %v4309_v32 = vld [vmem:[#allocation4 + $0x234] ss:$8 sps:$4 sm:$0xff]  }
 0x1d0   :  { %v2195_v47 = vpack.c.bf16 %v2190_v28, %v2190_v28  ;;  %v4312_v36 = vld [vmem:[#allocation4 + $0x244] ss:$8 sps:$4 sm:$0xff]  }
 0x1d1   :  { %v2196_v13 = vpack.c.bf16 %v2191_v37, %v2191_v37  ;;  %v4310_v37 = vld [vmem:[#allocation4 + $0x240] ss:$8 sps:$4 sm:$0xff]  }
 0x1d2   :  { %2738 = vmatpush1.bf16.msra.mxu1 %v4259_v38  ;;  %v4315_v38 = vld [vmem:[#allocation4 + $0x254] ss:$8 sps:$4 sm:$0xff]   ;;  %v4348_v28 = vld [vmem:[%s4752_s9 + $0x10] sm:$0xff]  }
 0x1d3   :  { %2763 = vmatprep.mubr.bf16.mxu1 %v2196_v13  ;;  %v4638_v20 = vpop.f32.mrb[8].mxu1  ;;  %2739 = vmatprep.subr.bf16.mxu1 %v4264_v52  ;;  %v4313_v52 = vld [vmem:[#allocation4 + $0x250] ss:$8 sps:$4 sm:$0xff]   ;;  %v4318_v13 = vld [vmem:[#allocation4 + $0x264] ss:$8 sps:$4 sm:$0xff]  }
 0x1d4   :  { %v3765_v41 = vpop.f32.mrb[9].mxu1 }
 0x1d5   :  { %v2185_v42 = vpop.f32.mrb[10].mxu1  ;;  %v4321_v41 = vld [vmem:[#allocation4 + $0x274] ss:$8 sps:$4 sm:$0xff]  }
 0x1d6   :  { %v3766_v43 = vpop.f32.mrb[11].mxu1  ;;  %2740 = vmatpush1.bf16.msra.mxu1 %v4262_v39 }
 0x1d7   :  { %2741 = vmatprep.subr.bf16.mxu1 %v4267_v40 }
 0x1da   :  { %2742 = vmatpush1.bf16.msra.mxu1 %v4265_v44  ;;  %v3670_v46 = vpop.f32.mrb[4].mxu0 }
 0x1db   :  { %v3671_v49 = vpop.f32.mrb[5].mxu0  ;;  %2743 = vmatprep.subr.bf16.mxu1 %v4270_v45 }
 0x1dc   :  { %v3672_v53 = vadd.f32 %v3671_v49, %v3670_v46  ;;  %v3673_v54 = vpop.f32.mrb[6].mxu0  ;;  %v4319_v46 = vld [vmem:[#allocation4 + $0x270] ss:$8 sps:$4 sm:$0xff]  }
 0x1dd   :  { %v3674_v55 = vpop.f32.mrb[7].mxu0  ;;  %v4335_v54 = vld [vmem:[%s4748_s5 + $0x30] sm:$0xff]  }
 0x1de   :  { %2744 = vmatpush1.bf16.msra.mxu1 %v4268_v48  ;;  %v2063_v21 = vadd.f32 %v3672_v53, %v392_v12  ;;  %v4334_v53 = vld [vmem:[%s4748_s5 + $0x70] sm:$0xff]   ;;  %v4336_v55 = vld [vmem:[%s4748_s5 + $0x78] sm:$0xff]  }
 0x1df   :  { %2745 = vmatprep.subr.bf16.mxu1 %v4273_v51  ;;  %3734 = vmatprep.subr.bf16.mxu0 %v4334_v53  ;;  %v4345_v12 = vld [vmem:[%s4750_s7 + $0x38] sm:$0xff]  }
 0x1e0   :  { %3735 = vmatpush3.bf16.msra.mxu0 %v4335_v54 }
 0x1e1   :  { %3736 = vmatprep.subr.bf16.mxu0 %v4336_v55 }
 0x1e2   :  { %2746 = vmatpush1.bf16.msra.mxu1 %v4271_v56  ;;  %v2278_v56 = vld [vmem:[%s4747_s4] sm:$0x3] }
 0x1e3   :  { %2747 = vmatprep.subr.bf16.mxu1 %v4276_v57  ;;  %v2283_v57 = vrot.slane %v2278_v56, %v375_v2  ;;  %v4340_v2 = vld [vmem:[%s4750_s7 + $0x10] sm:$0xff]  }
 0x1e6   :  { %2748 = vmatpush1.bf16.msra.mxu1 %v4274_v58  ;;  %v2287_v58 = vrot.slane %v2278_v56, %v379_v4  ;;  %v4341_v4 = vld [vmem:[%s4750_s7 + $0x18] sm:$0xff]  }
 0x1e7   :  { %2749 = vmatprep.subr.bf16.mxu1 %v4279_v23 }
 0x1ea   :  { %2750 = vmatpush1.bf16.msra.mxu1 %v4277_v59 }
 0x1eb   :  { %2751 = vmatprep.subr.bf16.mxu1 %v4282_v60 }
 0x1ee   :  { %2752 = vmatpush1.bf16.msra.mxu1 %v4280_v61 }
 0x1ef   :  { %2753 = vmatprep.subr.bf16.mxu1 %v4285_v63 }
 0x1f2   :  { %2754 = vmatpush1.bf16.msra.mxu1 %v4283_v1 }
 0x1f3   :  { %2755 = vmatprep.subr.bf16.mxu1 %v4288_v5 }
 0x1f6   :  { %2756 = vmatpush1.bf16.msra.mxu1 %v4286_v8 }
 0x1f7   :  { %2757 = vmatprep.subr.bf16.mxu1 %v4291_v35  ;;  %v4338_v35 = vld [vmem:[%s4750_s7] sm:$0xff]  }
 0x1fa   :  { %2758 = vmatpush1.bf16.msra.mxu1 %v4289_v9  ;;  %v3692_v14 = vpop.f32.mrb[8].mxu0  ;;  %v4342_v9 = vld [vmem:[%s4750_s7 + $0x20] sm:$0xff]  }
 0x1fb   :  { %v3693_v17 = vpop.f32.mrb[9].mxu0  ;;  %2759 = vmatprep.subr.bf16.mxu1 %v4294_v11  ;;  %v4344_v11 = vld [vmem:[%s4750_s7 + $0x30] sm:$0xff]  }
 0x1fc   :  { %v3694_v22 = vadd.f32 %v3693_v17, %v3692_v14  ;;  %v3695_v24 = vpop.f32.mrb[10].mxu0 }
 0x1fd   :  { %v3696_v25 = vpop.f32.mrb[11].mxu0 }
 0x1fe   :  { %v2103_v26 = vadd.f32 %v3694_v22, %v2063_v21  ;;  %2760 = vmatpush1.bf16.msra.mxu1 %v4292_v15  ;;  %v3618_v15 = vld [vmem:[%s4749_s6] ss:$0 sm:$0xff] }
 0x1ff   :  { %2761 = vmatprep.subr.bf16.mxu1 %v4297_v19  ;;  %v4346_v25 = vld [vmem:[%s4752_s9] sm:$0xff]  }
 0x202   :  { %2762 = vmatpush1.bf16.msra.mxu1 %v4295_v27  ;;  %v4347_v27 = vld [vmem:[%s4752_s9 + $0x8] sm:$0xff]  }
 0x203   :  { %2772 = vmatprep.subr.bf16.mxu1 %v4300_v29  ;;  %v4349_v29 = vld [vmem:[%s4752_s9 + $0x18] sm:$0xff]  }
 0x205   :  { %2764 = vmatmul.mubr.bf16.vlgmr.msra.gmra.mrb[12].mxu1 %v2195_v47 }
 0x206   :  { %2773 = vmatpush1.bf16.msra.mxu1 %v4298_v3  ;;  %2804 = vmatprep.mubr.bf16.mxu1 %v4415_v0  ;;  %v4316_v0 = vld [vmem:[#allocation4 + $0x260] ss:$8 sps:$4 sm:$0xff]   ;;  %v3635_v3 = vld [vmem:[%s4751_s8] ss:$0 sm:$0xff] }
 0x207   :  { %2774 = vmatprep.subr.bf16.mxu1 %v4303_v50 }
 0x20a   :  { %2775 = vmatpush1.bf16.msra.mxu1 %v4301_v30 }
 0x20b   :  { %2776 = vmatprep.subr.bf16.mxu1 %v4306_v18 }
 0x20e   :  { %2777 = vmatpush1.bf16.msra.mxu1 %v4304_v31 }
 0x20f   :  { %2778 = vmatprep.subr.bf16.mxu1 %v4309_v32 }
 0x212   :  { %2779 = vmatpush1.bf16.msra.mxu1 %v4307_v34 }
 0x213   :  { %2780 = vmatprep.subr.bf16.mxu1 %v4312_v36  ;;  %v4350_v36 = vld [vmem:[%s4754_s11] sm:$0xff]  }
 0x216   :  { %2781 = vmatpush1.bf16.msra.mxu1 %v4310_v37  ;;  %v4351_v37 = vld [vmem:[%s4754_s11 + $0x8] sm:$0xff]  }
 0x217   :  { %2782 = vmatprep.subr.bf16.mxu1 %v4315_v38  ;;  %v3644_v38 = vld [vmem:[%s4753_s10] ss:$0 sm:$0xff] }
 0x21a   :  { %v3714_v39 = vpop.f32.mrb[12].mxu0  ;;  %2783 = vmatpush1.bf16.msra.mxu1 %v4313_v52 }
 0x21b   :  { %v3715_v40 = vpop.f32.mrb[13].mxu0  ;;  %2784 = vmatprep.subr.bf16.mxu1 %v4318_v13 }
 0x21c   :  { %v3716_v42 = vadd.f32 %v3715_v40, %v3714_v39  ;;  %v3717_v43 = vpop.f32.mrb[14].mxu0 }
 0x21d   :  { %v3718_v44 = vpop.f32.mrb[15].mxu0 }
 0x21e   :  { %v2143_v45 = vadd.f32 %v3716_v42, %v2103_v26  ;;  %2785 = vmatpush1.bf16.msra.mxu1 %v4316_v0 }
 0x21f   :  { %2786 = vmatprep.subr.bf16.mxu1 %v4321_v41 }
 0x220   :  { %v2183_v48 = vadd.f32 %v4638_v20, %v2143_v45  ;;  %v4337_v20 = vld [vmem:[%s4748_s5 + $0x38] sm:$0xff]  }
 0x221   :  { %3737 = vmatpush3.bf16.msra.mxu0 %v4337_v20 }
 0x222   :  { %v2192_v49 = vmax.f32 %v2183_v48, 0.0  ;;  %2787 = vmatpush1.bf16.msra.mxu1 %v4319_v46  ;;  %3767 = vmatprep.subr.bf16.mxu0 %v4416_v33 }
 0x224   :  { %v2197_v51 = vpack.c.bf16 %v2192_v49, %v2192_v49 }
 0x226   :  { %2805 = vmatmul.mubr.bf16.vlgmr.msra.gmra.mrb[12].mxu1 %v2197_v51  ;;  %v3650_v51 = vld [vmem:[%s4755_s12] ss:$0 sm:$0xff] }
 0x2f9   :  { %v2806_v23 = vpop.f32.mrb[12].mxu1 }
 0x2fa   :  { %v3813_v59 = vadd.f32 %v2806_v23, %v2283_v57  ;;  %v2808_v60 = vpop.f32.mrb[13].mxu1 }
 0x2fb   :  { %v3814_v61 = vadd.f32 %v2808_v60, %v2287_v58  ;;  %v2810_v63 = vpop.f32.mrb[14].mxu1 }
 0x2fc   :  { %v2813_v1 = vmax.f32 %v3813_v59, 0.0  ;;  %v2811_v5 = vpop.f32.mrb[15].mxu1 }
 0x2fd   :  { %v2814_v8 = vmax.f32 %v3814_v61, 0.0 }
 0x2fe   :  { %v2815_v7 = vpack.c.bf16 %v2813_v1, %v2813_v1 }
 0x2ff   :  { %v2816_v6 = vpack.c.bf16 %v2814_v8, %v2814_v8 }
 0x301   :  { %2984 = vmatprep.mubr.bf16.mxu0 %v2816_v6 }
 0x302   :  { %2985 = vmatmul.mubr.bf16.vlgmr.msra.gmra.mrb[16].mxu0 %v2815_v7 }
 0x303   :  { %3768 = vmatpush3.bf16.msra.mxu0 %v4338_v35  ;;  %3783 = vmatprep.mubr.msk.bf16.mxu0 %vm4417_vm1, %v4416_v33 }
 0x304   :  { %3769 = vmatprep.subr.bf16.mxu0 %v4416_v33 }
 0x307   :  { %3770 = vmatpush3.bf16.msra.mxu0 %v4339_v62 }
 0x308   :  { %3771 = vmatprep.subr.bf16.mxu0 %v4416_v33 }
 0x30b   :  { %3772 = vmatpush3.bf16.msra.mxu0 %v4340_v2 }
 0x30c   :  { %3773 = vmatprep.subr.bf16.mxu0 %v4416_v33 }
 0x30f   :  { %3774 = vmatpush3.bf16.msra.mxu0 %v4341_v4 }
 0x310   :  { %3775 = vmatprep.subr.bf16.mxu0 %v4416_v33 }
 0x313   :  { %3776 = vmatpush3.bf16.msra.mxu0 %v4342_v9 }
 0x314   :  { %3777 = vmatprep.subr.bf16.mxu0 %v4416_v33 }
 0x317   :  { %3778 = vmatpush3.bf16.msra.mxu0 %v4343_v10 }
 0x318   :  { %3779 = vmatprep.subr.bf16.mxu0 %v4416_v33 }
 0x31b   :  { %3780 = vmatpush3.bf16.msra.mxu0 %v4344_v11 }
 0x31c   :  { %3781 = vmatprep.subr.bf16.mxu0 %v4416_v33 }
 0x31f   :  { %3782 = vmatpush3.bf16.msra.mxu0 %v4345_v12 }
 0x320   :  { %3787 = vmatprep.subr.bf16.mxu0 %v4416_v33 }
 0x3d5   :  { %v3738_v14 = vpop.f32.mrb[16].mxu0 }
 0x3d6   :  { %v3739_v16 = vpop.f32.mrb[17].mxu0 }
 0x3d7   :  { %v3740_v17 = vadd.f32 %v3739_v16, %v3738_v14  ;;  %v3741_v19 = vpop.f32.mrb[18].mxu0 }
 0x3d8   :  { %v3742_v21 = vpop.f32.mrb[19].mxu0 }
 0x3d9   :  { %v2987_v22 = vadd.f32 %v3740_v17, %v3618_v15 }
 0x3db   :  { %v2992_v24 = vmax.f32 %v2987_v22, 0.0 }
 0x3dd   :  { %v2993_v26 = vpack.c.bf16 %v2992_v24, %v2992_v24 }
 0x3df   :  { %3784 = vmatmul.mubr.bf16.vlgmr.msra.gmra.mrb[20].mxu0 %v2993_v26 }
 0x3e0   :  { %3788 = vmatpush3.bf16.msra.mxu0 %v4346_v25  ;;  %3795 = vmatprep.mubr.msk.bf16.mxu0 %vm4417_vm1, %v4416_v33 }
 0x3e1   :  { %3789 = vmatprep.subr.bf16.mxu0 %v4416_v33 }
 0x3e4   :  { %3790 = vmatpush3.bf16.msra.mxu0 %v4347_v27 }
 0x3e5   :  { %3791 = vmatprep.subr.bf16.mxu0 %v4416_v33 }
 0x3e8   :  { %3792 = vmatpush3.bf16.msra.mxu0 %v4348_v28 }
 0x3e9   :  { %3793 = vmatprep.subr.bf16.mxu0 %v4416_v33 }
 0x3ec   :  { %3794 = vmatpush3.bf16.msra.mxu0 %v4349_v29 }
 0x3ed   :  { %3799 = vmatprep.subr.bf16.mxu0 %v4416_v33 }
 0x4b2   :  { %v3099_v47 = vpop.f32.mrb[20].mxu0 }
 0x4b3   :  { %v3100_v50 = vadd.f32 %v3635_v3, %v3099_v47  ;;  %v3785_v30 = vpop.f32.mrb[21].mxu0 }
 0x4b4   :  { %v3102_v18 = vpop.f32.mrb[22].mxu0 }
 0x4b5   :  { %v3105_v31 = vmax.f32 %v3100_v50, 0.0  ;;  %v3786_v32 = vpop.f32.mrb[23].mxu0 }
 0x4b7   :  { %v3106_v34 = vpack.c.bf16 %v3105_v31, %v3105_v31 }
 0x4b9   :  { %3796 = vmatmul.mubr.msk.bf16.vlgmr.msra.gmra.mrb[24].mxu0 %vm3146_vm2, %v3106_v34 }
 0x4ba   :  { %3803 = vmatprep.mubr.msk.bf16.mxu0 %vm4417_vm1, %v4416_v33  ;;  %3800 = vmatpush3.bf16.msra.mxu0 %v4350_v36 }
 0x4bb   :  { %3801 = vmatprep.subr.bf16.mxu0 %v4416_v33 }
 0x4be   :  { %3802 = vmatpush3.bf16.msra.mxu0 %v4351_v37 }
 0x58c   :  { %v3184_v52 = vpop.f32.mrb[24].mxu0 }
 0x58d   :  { %v3185_v13 = vadd.f32 %v3644_v38, %v3184_v52  ;;  %v3797_v39 = vpop.f32.mrb[25].mxu0 }
 0x58e   :  { %v3187_v0 = vpop.f32.mrb[26].mxu0 }
 0x58f   :  { %v3190_v40 = vand.u32 2147483647, %v3185_v13  ;;  %v3798_v41 = vpop.f32.mrb[27].mxu0  ;;  %vm3196_vm3 = vcmp.ge.f32.partialorder %v3185_v13, 0.0 }
 0x591   :  { %v3191_v42 = vsub.f32 0.0, %v3190_v40 }
 0x593   :  { %v3192_v43 = vmul.f32 1.442695, %v3191_v42 }
 0x595   :  { %4352 = vpow2.f32 %v3192_v43 }
 0x59f   :  { %v4353_v44 = vpop.eup %4352 }
 0x5a0   :  { %v3194_v33 = vadd.f32 1.0, %v4353_v44 }
 0x5a2   :  { %4354 = vrcp.f32 %v3194_v33 }
 0x5ac   :  { %v4355_v45 = vpop.eup %4354 }
 0x5ad   :  { %v3197_v46 = vmul.f32 %v4355_v45, %v4353_v44 }
 0x5af   :  { %v3198_v48 = vsel %vm3196_vm3, %v4355_v45, %v3197_v46 }
 0x5b0   :  { %v3199_v49 = vpack.c.bf16 %v3198_v48, %v3198_v48 }
 0x5b2   :  { %3804 = vmatmul.mubr.msk.bf16.vlgmr.msra.gmra.mrb[28].mxu0 %vm3223_vm4, %v3199_v49 }
 0x685   :  { %v3261_v53 = vpop.f32.mrb[28].mxu0 }
 0x686   :  { %v3262_v54 = vadd.f32 %v3650_v51, %v3261_v53  ;;  %v3805_v55 = vpop.f32.mrb[29].mxu0 }
 0x687   :  { %v3264_v20 = vpop.f32.mrb[30].mxu0 }
 0x688   :  { %3267 = vmax.xlane.f32.xlu0 %v3262_v54  ;;  %v3806_v56 = vpop.f32.mrb[31].mxu0 }
 0x715   :  { %v3268_v57 = vpop.xlane.xlu0 %3267 }
 0x716   :  { %v3269_v58 = vsub.f32 %v3262_v54, %v3268_v57 }
 0x718   :  { %v3270_v23 = vmul.f32 1.442695, %v3269_v58 }
 0x71a   :  { %4356 = vpow2.f32 %v3270_v23 }
 0x724   :  { %v4357_v59 = vpop.eup %4356 }
 0x725   :  { %3272 = vadd.xlane.f32.xlu0 %v4357_v59 }
 0x7b2   :  { %v3273_v60 = vpop.xlane.xlu0 %3272 }
 0x7b3   :  { %4358 = vrcp.f32 %v3273_v60 }
 0x7bd   :  { %v4359_v61 = vpop.eup %4358 }
 0x7be   :  { %v3275_v63 = vmul.f32 %v4359_v61, %v4357_v59 }
 0x7c0   :  { %3276 = vst [vmem:[%s4756_s13] sm:$0xff] %v3275_v63 }
 0x7c1   :  { %3281 = vsyncpa [#allocation3], 1 }
 0x7c2   :  { %3282 = vsyncpa [#allocation5], 1 }

</bundles_post_ra>
